<compile_context>
chip_gen: v7x
topology: tpu7x:2x2x1
jax: 0.10.0
libtpu: 0.0.40
codegen_flags: <defaults>
</compile_context>

<pallas_src>
import numpy as np
import jax
import jax.numpy as jnp
from jax.experimental import pallas as pl
from jax.experimental.pallas import tpu as pltpu

NODE_KEY_LIST = ['index', 'checkable', 'checked', 'clickable', 'enabled',
                 'focusable', 'focused', 'scrollable', 'long-clickable',
                 'password', 'selected', 'visible-to-user', 'bounds',
                 'content-desc', 'resource-id', 'class', 'package']
L = len(NODE_KEY_LIST)            # 17
N_KERNELS = (10, 10, 10)
KERNEL_SIZES = (1, 2, 3)
C_TOTAL = sum(N_KERNELS)          # 30
K_MAX = max(KERNEL_SIZES)         # 3
_NEG = np.float32(-1e30)          # finite "-inf" for the pre-maxpool mask


def _build_time_mask():
    """Static additive validity mask: 0 where (time, branch) is a valid conv
    output position, -1e30 where it is not (no padding => branch with kernel k
    only produces L-k+1 positions).  Depends only on static config, so it is a
    host-side numpy constant (no in-kernel iota / where chain)."""
    m = np.zeros((1, L, C_TOTAL), np.float32)
    off = 0
    for nk, k in zip(N_KERNELS, KERNEL_SIZES):
        m[0, L - k + 1:, off:off + nk] = _NEG
        off += nk
    return m


_TIME_MASK = _build_time_mask()


def _action_encoder_kernel(x_ref, w_ref, bc_ref, wl_ref, bl_ref, mask_ref, o_ref):
    """One grid step: `tile` UI nodes.

    x_ref   : (tile*L, K_MAX*E)  im2col'd node-key embeddings (compute dtype)
    w_ref   : (K_MAX*E, C)       packed conv weights (compute dtype)
    bc_ref  : (1, C)             packed conv biases (f32)
    wl_ref  : (C, E)             linear weight, pre-transposed (compute dtype)
    bl_ref  : (1, E)             linear bias (f32)
    mask_ref: (1, L, C)          additive 0 / -1e30 validity mask (f32)
    o_ref   : (tile, E)          sigmoid(linear(maxpool(relu(conv)))) output
    """
    rows = x_ref.shape[0]
    tn = rows // L

    # All three Conv1d branches in one MXU push, f32 accumulation.
    # Rows of x that straddle a node boundary (or the zero padding at the end)
    # only feed (time, branch) positions that the mask kills below, so the
    # single big contraction is exact for every valid position.
    acc = jnp.dot(x_ref[...], w_ref[...],
                  preferred_element_type=jnp.float32)        # (rows, C)

    # Per-node view, kill invalid trailing positions per branch, max over time.
    # Bias + ReLU after the max (monotone), so they act on (tn, C) only.
    # NOTE: 17 is not a multiple of the 8-sublane tile, so this reshape may
    # relayout; padding time 17->24 in the wrapper would avoid it at ~1.4x
    # matmul rows — profile before switching.
    acc = acc.reshape(tn, L, C_TOTAL) + mask_ref[...]
    pooled = jnp.max(acc, axis=1)                             # (tn, C)
    feat = jnp.maximum(pooled + bc_ref[...], 0.0)             # bias + ReLU, f32

    # Final Linear: compute-dtype operands (bf16 by default), f32 accumulation.
    y = jnp.dot(feat.astype(wl_ref.dtype), wl_ref[...],
                preferred_element_type=jnp.float32) + bl_ref[...]
    o_ref[...] = jax.nn.sigmoid(y).astype(o_ref.dtype)


def _choose_tile_nodes(n_nodes):
    """Node-tile size for the 1-D grid.

    * n_nodes <= 32: single grid step (per-step overhead ~0.35us dominates).
    * otherwise: ~N/2 rounded up to a multiple of 8 (so the (tile*17, .) input
      block is sublane-aligned) => >= 2 "parallel" steps and both v7x
      TensorCores get work; capped at 256 nodes/step for large N, which keeps
      the f32 intermediates at a few MiB — far under the 32 MiB scoped VMEM
      limit on every generation (incl. v7x's 64 MiB physical VMEM).
    N is padded up to a multiple of the tile in the wrapper, so no divisor
    requirement exists and no single-giant-step fallback is ever taken.
    """
    if n_nodes <= 32:
        return n_nodes
    half = (n_nodes + 1) // 2
    tile = ((half + 7) // 8) * 8
    return min(tile, 256)


def init_params(key, embedding_dim):
    """Deterministic synthetic parameters with the same shapes as the PyTorch module."""
    keys = jax.random.split(key, 8)
    params = {'embedding_dim': embedding_dim, 'conv_w': [], 'conv_b': []}
    for i, (c, k) in enumerate(zip(N_KERNELS, KERNEL_SIZES)):
        params['conv_w'].append(
            0.1 * jax.random.normal(keys[i], (c, embedding_dim, k), jnp.float32))
        params['conv_b'].append(
            0.1 * jax.random.normal(keys[3 + i], (c,), jnp.float32))
    params['lin_w'] = 0.1 * jax.random.normal(keys[6], (embedding_dim, C_TOTAL), jnp.float32)
    params['lin_b'] = 0.1 * jax.random.normal(keys[7], (embedding_dim,), jnp.float32)
    return params


def action_encoder_pallas(arg_seqs, params, *, tile_nodes=None,
                          compute_dtype=jnp.bfloat16, out_dtype=jnp.float32):
    B, n_nodes = arg_seqs.shape[0], arg_seqs.shape[1]
    assert B == 1                          # mirrors the PyTorch forward's assertion
    E = params['embedding_dim']
    N = B * n_nodes

    if tile_nodes is None:
        tile_nodes = _choose_tile_nodes(N)
    if tile_nodes >= N:
        tile_nodes, n_pad = N, N                       # single grid step
    else:
        tile_nodes = max(8, (tile_nodes // 8) * 8)     # sublane-align (tile*17, .) blocks
        n_pad = pl.cdiv(N, tile_nodes) * tile_nodes    # pad nodes; sliced off below
    grid = n_pad // tile_nodes

    # --- wrapper-side im2col -------------------------------------------------
    # x_im2col[n*L + t, j*E:(j+1)*E] = x[n, t+j]  (zeros past the end).
    # Combined with the per-branch validity mask inside the kernel, the whole
    # conv stack becomes one (rows, 3E) @ (3E, 30) matmul.
    rows_real = N * L
    rows_pad = n_pad * L
    x_flat = arg_seqs.reshape(rows_real, E).astype(compute_dtype)
    x_flat = jnp.pad(x_flat, ((0, rows_pad - rows_real + K_MAX - 1), (0, 0)))
    x_im2col = jnp.concatenate(
        [x_flat[j:j + rows_pad] for j in range(K_MAX)], axis=1)   # (rows_pad, 3E)

    # Packed conv weights: rows [j*E:(j+1)*E] hold tap j for every branch,
    # zero where j >= that branch's kernel size.
    taps = []
    for w, k in zip(params['conv_w'], KERNEL_SIZES):
        w_kec = jnp.transpose(w, (2, 1, 0))                        # (k, E, Cout)
        pad = jnp.zeros((K_MAX - k, E, w.shape[0]), w.dtype)
        taps.append(jnp.concatenate([w_kec, pad], axis=0))         # (K_MAX, E, Cout)
    w_packed = jnp.concatenate(taps, axis=2).reshape(K_MAX * E, C_TOTAL)
    w_packed = w_packed.astype(compute_dtype)                      # (3E, C)
    b_conv = jnp.concatenate(params['conv_b']).reshape(1, C_TOTAL).astype(jnp.float32)
    wl = jnp.transpose(params['lin_w'], (1, 0)).astype(compute_dtype)   # (C, E)
    bl = params['lin_b'].reshape(1, E).astype(jnp.float32)
    mask = jnp.asarray(_TIME_MASK)                                  # (1, L, C) f32

    out = pl.pallas_call(
        _action_encoder_kernel,
        out_shape=jax.ShapeDtypeStruct((n_pad, E), out_dtype),
        grid_spec=pltpu.PrefetchScalarGridSpec(
            num_scalar_prefetch=0,
            grid=(grid,),
            in_specs=[
                pl.BlockSpec((tile_nodes * L, K_MAX * E), lambda i: (i, 0)),
                pl.BlockSpec((K_MAX * E, C_TOTAL), lambda i: (0, 0)),
                pl.BlockSpec((1, C_TOTAL), lambda i: (0, 0)),
                pl.BlockSpec((C_TOTAL, E), lambda i: (0, 0)),
                pl.BlockSpec((1, E), lambda i: (0, 0)),
                pl.BlockSpec((1, L, C_TOTAL), lambda i: (0, 0, 0)),
            ],
            out_specs=pl.BlockSpec((tile_nodes, E), lambda i: (i, 0)),
        ),
        compiler_params=pltpu.CompilerParams(
            dimension_semantics=("parallel",),
            vmem_limit_bytes=32 * 1024 * 1024),   # v5e default scoped limit is only 16 MiB
    )(x_im2col, w_packed, b_conv, wl, bl, mask)

    out = out[:N]                                   # drop padded nodes
    return out.reshape(B, n_nodes, E)


def action_encoder_ref(arg_seqs, params):
    """Pure-JAX f32 reference mirroring the PyTorch forward exactly."""
    B, n_nodes = arg_seqs.shape[0], arg_seqs.shape[1]
    E = params['embedding_dim']
    N = B * n_nodes
    x = arg_seqs.reshape(N, L, E).astype(jnp.float32)   # (N, L, E)
    feats = []
    for w, b, k in zip(params['conv_w'], params['conv_b'], KERNEL_SIZES):
        lout = L - k + 1
        y = jnp.zeros((N, lout, w.shape[0]), jnp.float32)
        for j in range(k):
            y = y + jnp.einsum('nle,ce->nlc', x[:, j:j + lout, :], w[:, :, j])
        y = jax.nn.relu(y + b)
        feats.append(jnp.max(y, axis=1))
    f = jnp.concatenate(feats, axis=1)
    y = jax.nn.sigmoid(f @ params['lin_w'].T + params['lin_b'])
    return y.reshape(B, n_nodes, E)


if __name__ == "__main__":
    key = jax.random.PRNGKey(0)
    k_params, k_in1, k_in2 = jax.random.split(key, 3)

    E = 32          # arg_embedding_dim
    B = 1           # forward asserts B == 1
    params = init_params(k_params, E)

    # --- small shape: single grid step ---------------------------------------
    n1 = 16
    x1 = jax.random.normal(k_in1, (B, n1, L, E), jnp.float32)
    ref1 = jax.block_until_ready(action_encoder_ref(x1, params))

    out1_f32 = jax.block_until_ready(
        action_encoder_pallas(x1, params, compute_dtype=jnp.float32))
    np.testing.assert_allclose(np.asarray(out1_f32), np.asarray(ref1),
                               rtol=1e-5, atol=1e-5)

    out1_bf16 = jax.block_until_ready(action_encoder_pallas(x1, params))
    np.testing.assert_allclose(np.asarray(out1_bf16), np.asarray(ref1),
                               rtol=5e-2, atol=2e-2)

    # --- larger shape: exercises padding + multi-step "parallel" grid --------
    n2 = 100        # no multiple-of-8 divisor <= 128: previously the hazard case
    x2 = jax.random.normal(k_in2, (B, n2, L, E), jnp.float32)
    ref2 = jax.block_until_ready(action_encoder_ref(x2, params))

    out2_f32 = jax.block_until_ready(
        action_encoder_pallas(x2, params, compute_dtype=jnp.float32))
    np.testing.assert_allclose(np.asarray(out2_f32), np.asarray(ref2),
                               rtol=1e-5, atol=1e-5)

    assert out1_f32.shape == (B, n1, E)
    assert out1_bf16.shape == (B, n1, E)
    assert out2_f32.shape == (B, n2, E)
    print("KERNEL_OK")
</pallas_src>

<mosaic_0001>
module attributes {stable_mosaic.version = 11 : i64} {
  func.func @_action_encoder_kernel(%arg0: i32, %arg1: memref<272x96xf32, #tpu.memory_space<vmem>>, %arg2: memref<96x30xf32, #tpu.memory_space<vmem>>, %arg3: memref<1x30xf32, #tpu.memory_space<vmem>>, %arg4: memref<30x32xf32, #tpu.memory_space<vmem>>, %arg5: memref<1x32xf32, #tpu.memory_space<vmem>>, %arg6: memref<1x17x30xf32, #tpu.memory_space<vmem>>, %arg7: memref<16x32xf32, #tpu.memory_space<vmem>>) attributes {dimension_semantics = [#tpu.dimension_semantics<parallel>], iteration_bounds = array<i64: 1>, scalar_prefetch = 0 : i64, scratch_operands = 0 : i64, tpu.core_type = #tpu.core_type<tc>, window_params = [{transform_indices = @transform_0, window_bounds = array<i64: 272, 96>}, {pipeline_mode = #tpu.pipeline_mode<synchronous>, transform_indices = @transform_1, window_bounds = array<i64: 96, 30>}, {pipeline_mode = #tpu.pipeline_mode<synchronous>, transform_indices = @transform_2, window_bounds = array<i64: 1, 30>}, {pipeline_mode = #tpu.pipeline_mode<synchronous>, transform_indices = @transform_3, window_bounds = array<i64: 30, 32>}, {pipeline_mode = #tpu.pipeline_mode<synchronous>, transform_indices = @transform_4, window_bounds = array<i64: 1, 32>}, {pipeline_mode = #tpu.pipeline_mode<synchronous>, transform_indices = @transform_5, window_bounds = array<i64: 1, 17, 30>}, {transform_indices = @transform_6, window_bounds = array<i64: 16, 32>}]} {
    %c0 = arith.constant 0 : index
    %c0_0 = arith.constant 0 : index
    %0 = vector.load %arg1[%c0, %c0_0] : memref<272x96xf32, #tpu.memory_space<vmem>>, vector<272x96xf32>
    %c0_1 = arith.constant 0 : index
    %c0_2 = arith.constant 0 : index
    %1 = vector.load %arg2[%c0_1, %c0_2] : memref<96x30xf32, #tpu.memory_space<vmem>>, vector<96x30xf32>
    %cst = arith.constant dense<0.000000e+00> : vector<272x30xf32>
    %2 = tpu.matmul %0, %1, %cst {dimension_numbers = #tpu.dot_dimension_numbers<[1], [0], [0], [1], [0, 0, 1, 1], [], []>} : vector<272x96xf32>, vector<96x30xf32>, vector<272x30xf32> -> vector<272x30xf32>
    %3 = vector.shape_cast %2 : vector<272x30xf32> to vector<16x17x30xf32>
    %c0_3 = arith.constant 0 : index
    %c0_4 = arith.constant 0 : index
    %c0_5 = arith.constant 0 : index
    %4 = vector.load %arg6[%c0_3, %c0_4, %c0_5] : memref<1x17x30xf32, #tpu.memory_space<vmem>>, vector<1x17x30xf32>
    %5 = vector.broadcast %4 : vector<1x17x30xf32> to vector<16x17x30xf32>
    %6 = arith.addf %3, %5 : vector<16x17x30xf32>
    %cst_6 = arith.constant dense<0xFF800000> : vector<16x30xf32>
    %7 = vector.multi_reduction <maximumf>, %6, %cst_6 [1] : vector<16x17x30xf32> to vector<16x30xf32>
    %c0_7 = arith.constant 0 : index
    %c0_8 = arith.constant 0 : index
    %8 = vector.load %arg3[%c0_7, %c0_8] : memref<1x30xf32, #tpu.memory_space<vmem>>, vector<1x30xf32>
    %9 = vector.broadcast %8 : vector<1x30xf32> to vector<16x30xf32>
    %10 = arith.addf %7, %9 : vector<16x30xf32>
    %cst_9 = arith.constant 0.000000e+00 : f32
    %11 = vector.broadcast %cst_9 : f32 to vector<16x30xf32>
    %12 = arith.maximumf %10, %11 : vector<16x30xf32>
    %c0_10 = arith.constant 0 : index
    %c0_11 = arith.constant 0 : index
    %13 = vector.load %arg4[%c0_10, %c0_11] : memref<30x32xf32, #tpu.memory_space<vmem>>, vector<30x32xf32>
    %cst_12 = arith.constant dense<0.000000e+00> : vector<16x32xf32>
    %14 = tpu.matmul %12, %13, %cst_12 {dimension_numbers = #tpu.dot_dimension_numbers<[1], [0], [0], [1], [0, 0, 1, 1], [], []>} : vector<16x30xf32>, vector<30x32xf32>, vector<16x32xf32> -> vector<16x32xf32>
    %c0_13 = arith.constant 0 : index
    %c0_14 = arith.constant 0 : index
    %15 = vector.load %arg5[%c0_13, %c0_14] : memref<1x32xf32, #tpu.memory_space<vmem>>, vector<1x32xf32>
    %16 = vector.broadcast %15 : vector<1x32xf32> to vector<16x32xf32>
    %17 = arith.addf %14, %16 : vector<16x32xf32>
    %18 = arith.negf %17 : vector<16x32xf32>
    %19 = math.exp %18 : vector<16x32xf32>
    %cst_15 = arith.constant 1.000000e+00 : f32
    %20 = vector.broadcast %cst_15 : f32 to vector<16x32xf32>
    %21 = arith.addf %20, %19 : vector<16x32xf32>
    %22 = arith.divf %20, %21 : vector<16x32xf32>
    %c0_16 = arith.constant 0 : index
    %c0_17 = arith.constant 0 : index
    %23 = vector.load %arg7[%c0_16, %c0_17] : memref<16x32xf32, #tpu.memory_space<vmem>>, vector<16x32xf32>
    tpu.vector_store %arg7[%c0_16, %c0_17], %22 {strides = array<i32>} : memref<16x32xf32, #tpu.memory_space<vmem>>, vector<16x32xf32>,
    return
  }
  func.func @transform_0(%arg0: i32) -> (i32, i32) {
    %c0_i32 = arith.constant 0 : i32
    %c0_i32_0 = arith.constant 0 : i32
    return %arg0, %c0_i32 : i32, i32
  }
  func.func @transform_1(%arg0: i32) -> (i32, i32) {
    %c0_i32 = arith.constant 0 : i32
    %c0_i32_0 = arith.constant 0 : i32
    %c0_i32_1 = arith.constant 0 : i32
    return %c0_i32, %c0_i32_0 : i32, i32
  }
  func.func @transform_2(%arg0: i32) -> (i32, i32) {
    %c0_i32 = arith.constant 0 : i32
    %c0_i32_0 = arith.constant 0 : i32
    %c0_i32_1 = arith.constant 0 : i32
    return %c0_i32, %c0_i32_0 : i32, i32
  }
  func.func @transform_3(%arg0: i32) -> (i32, i32) {
    %c0_i32 = arith.constant 0 : i32
    %c0_i32_0 = arith.constant 0 : i32
    %c0_i32_1 = arith.constant 0 : i32
    return %c0_i32, %c0_i32_0 : i32, i32
  }
  func.func @transform_4(%arg0: i32) -> (i32, i32) {
    %c0_i32 = arith.constant 0 : i32
    %c0_i32_0 = arith.constant 0 : i32
    %c0_i32_1 = arith.constant 0 : i32
    return %c0_i32, %c0_i32_0 : i32, i32
  }
  func.func @transform_5(%arg0: i32) -> (i32, i32, i32) {
    %c0_i32 = arith.constant 0 : i32
    %c0_i32_0 = arith.constant 0 : i32
    %c0_i32_1 = arith.constant 0 : i32
    %c0_i32_2 = arith.constant 0 : i32
    return %c0_i32, %c0_i32_0, %c0_i32_1 : i32, i32, i32
  }
  func.func @transform_6(%arg0: i32) -> (i32, i32) {
    %c0_i32 = arith.constant 0 : i32
    %c0_i32_0 = arith.constant 0 : i32
    return %arg0, %c0_i32 : i32, i32
  }
}

</mosaic_0001>

<bundles_post_ra>
// kernel: tpu_custom_call.1
= control target key start
LH: loop header
LB: loop body
LE: loop exit
PB: predicated region body
PF: predicated region fallthrough
CT: control target
= control target key end

     0   :  { %11 = vsyncpa [#allocation3], 0  ;;  %s7197_s0 = inlined_call_operand.hbm [shape: f32[272,96], index: 0, kind: input, shape index: {}]   ;;  %s7198_s1 = inlined_call_operand.vmem [shape: f32[96,30], index: 1, kind: input, shape index: {}]   ;;  %s7199_s2 = inlined_call_operand.vmem [shape: f32[1,30], index: 2, kind: input, shape index: {}]   ;;  %s7200_s3 = inlined_call_operand.vmem [shape: f32[30,32], index: 3, kind: input, shape index: {}]   ;;  %s7201_s4 = inlined_call_operand.vmem [shape: f32[1,32], index: 4, kind: input, shape index: {}]   ;;  %s7202_s5 = inlined_call_operand.vmem [shape: f32[1,17,30], index: 5, kind: input, shape index: {}]   ;;  %s7203_s6 = inlined_call_operand.hbm [shape: f32[16,32], index: 6, kind: output, shape index: {}]  }
   0x1   :  { %12 = vsyncpa [#allocation4], 0  ;;  %s5598_s21 = smov [#allocation2]   ;;  %s5550_s25 = scalar_lea.hbm %s7197_s0, 4352 }
   0x2   :  { %s18_s22 = sshll.u32 %s5598_s21, 4  ;;  %p5551_p0 = scmp.ne.s32.totalorder %s7197_s0, %s5550_s25  ;;  %s19_s22 = int_to_ptr.vmem [resolvable:$true] %s18_s22 }
   0x3   :  { %p5554_p1 = scmp.lt.u32.totalorder %s5550_s25, %s7197_s0 }
   0x5   :  { %p5556_p2 = pnand %p5554_p1, %p5551_p0 }
   0x7   :  { %5559 = shalt.err (!%p5556_p2)
}
   0x8   :  { %s5560_s30 = scalar_lea.vmem %s19_s22, 4352  ;;  %p5565_p4 = scmp.lt.s32.totalorder %s19_s22, %s19_s22 }
   0x9   :  { %p5561_p3 = scmp.ne.s32.totalorder %s19_s22, %s5560_s30  ;;  %p5566_p5 = scmp.lt.s32.totalorder %s5560_s30, %s5560_s30 }
   0xb   :  { %p5567_p6 = por %p5566_p5, %p5565_p4 }
   0xd   :  { %p5568_p7 = pnand %p5567_p6, %p5561_p3 }
   0xf   :  { %5571 = shalt.err (!%p5568_p7)
}
  0x10   :  { %s5599_s7 = smov 128   ;;  %s5600_s8 = smov 8  }
  0x11   :  { %24 = dma.hbm_to_vmem [thread:$0]  %s7197_s0, 4352, %s19_s22, [#allocation3], %s5599_s7, %s5599_s7, %s5600_s8  }
  0x12   :  { %5594 = dma.done.wait [#allocation3], 4352  }
  0x13   :  { %5595 = vsyncadd [#allocation3], 4294962944  ;;  %v72_v0 = vld [vmem:[%s7198_s1] sm:$0xff]  ;;  %v73_v1 = vld [vmem:[%s7198_s1 + $0x8] sm:$0xff]  ;;  %vm84_vm0 = vcmask 785408   ;;  %v460_v54 = vlaneseq  ;;  %vm4917_vm1 = vcmask 237568  }
  0x14   :  { %v74_v2 = vld [vmem:[%s7198_s1 + $0x10] sm:$0xff]  ;;  %v5487_v3 = vpack.c.bf16 %v73_v1, %v72_v0  ;;  %v75_v4 = vld [vmem:[%s7198_s1 + $0x18] sm:$0xff]  ;;  %v76_v6 = vld [vmem:[%s7198_s1 + $0x20] sm:$0xff]  ;;  %v5601_v52 = vmov 1966171168   ;;  %vm4913_vm2 = vcmask 244736  }
  0x15   :  { %v5491_v5 = vpack.c.bf16 %v75_v4, %v74_v2  ;;  %v77_v7 = vld [vmem:[%s7198_s1 + $0x28] sm:$0xff]  ;;  %v38_v8 = vld [vmem:[#allocation2] sm:$0xff]  ;;  %v56_v9 = vld [vmem:[#allocation2 + $0x90] sm:$0xff]  ;;  %v458_v53 = vunpack.c.l.s4 %v5601_v52  ;;  %v461_v56 = vshrl.u32 %v460_v54, 7  ;;  %vm5196_vm3 = vcmask 1045504   ;;  %s5603_s27 = smov [#allocation5]  }
  0x16   :  { %5488 = vmatprep.subr.bf16.mxu0 %v5487_v3  ;;  %5521 = vmatprep.subr.bf16.mxu1 %v5487_v3  ;;  %v5495_v10 = vpack.c.bf16 %v77_v7, %v76_v6  ;;  %v78_v11 = vld [vmem:[%s7198_s1 + $0x30] sm:$0xff]  ;;  %v79_v12 = vld [vmem:[%s7198_s1 + $0x38] sm:$0xff]  ;;  %v80_v14 = vld [vmem:[%s7198_s1 + $0x40] sm:$0xff]  ;;  %vm5602_vm4 = vmmov 1   ;;  %vm5158_vm6 = vcmask 1041409   ;;  %vm5161_vm7 = vcmask 1042434  }
  0x17   :  { %5490 = vmatpush3.bf16.msra.mxu0 %v5487_v3  ;;  %5527 = vmatpush3.bf16.msra.mxu1 %v5487_v3  ;;  %v5499_v13 = vpack.c.bf16 %v79_v12, %v78_v11  ;;  %v81_v15 = vld [vmem:[%s7198_s1 + $0x48] sm:$0xff]  ;;  %v82_v17 = vld [vmem:[%s7198_s1 + $0x50] sm:$0xff]  ;;  %v83_v18 = vld [vmem:[%s7198_s1 + $0x58] sm:$0xff]  ;;  %v459_v55 = vunpack.c.0.s8 %v458_v53  ;;  %vm5164_vm8 = vcmask 1043459   ;;  %vm5167_vm9 = vcmask 1044484   ;;  %s5295_s28 = sshll.u32 %s5603_s27, 4  ;;  %s5296_s28 = int_to_ptr.vmem [resolvable:$true] %s5295_s28 }
  0x18   :  { %5492 = vmatprep.subr.bf16.mxu0 %v5491_v5  ;;  %5522 = vmatprep.subr.bf16.mxu1 %v5491_v5  ;;  %v5503_v16 = vpack.c.bf16 %v81_v15, %v80_v14  ;;  %v5507_v19 = vpack.c.bf16 %v83_v18, %v82_v17  ;;  %v39_v20 = vld [vmem:[#allocation2 + $0x8] sm:$0xff]  ;;  %v57_v21 = vld [vmem:[#allocation2 + $0x98] sm:$0xff]  ;;  %v40_v22 = vld [vmem:[#allocation2 + $0x10] sm:$0xff]  ;;  %vm5170_vm10 = vcmask 1045509   ;;  %vm5173_vm11 = vcmask 1046534   ;;  %p5577_p9 = scmp.lt.s32.totalorder %s5296_s28, %s5296_s28 }
  0x19   :  { %5425 = vmatprep.mubr.msk.f32.mxu0 %vm84_vm0, %v38_v8  ;;  %5452 = vmatprep.mubr.msk.f32.mxu1 %vm84_vm0, %v56_v9  ;;  %v58_v23 = vld [vmem:[#allocation2 + $0xa0] sm:$0xff]  ;;  %v41_v24 = vld [vmem:[#allocation2 + $0x18] sm:$0xff]  ;;  %v59_v25 = vld [vmem:[#allocation2 + $0xa8] sm:$0xff]  ;;  %v5727_v58 = vsub.s32 %v459_v55, %v461_v56  ;;  %vm5176_vm12 = vcmask 1047559   ;;  %vm5287_vm13 = vcmask 261120  }
  0x1a   :  { %v42_v26 = vld [vmem:[#allocation2 + $0x20] sm:$0xff]  ;;  %v60_v27 = vld [vmem:[#allocation2 + $0xb0] sm:$0xff]  ;;  %v43_v28 = vld [vmem:[#allocation2 + $0x28] sm:$0xff] }
  0x1b   :  { %5494 = vmatpush3.bf16.msra.mxu0 %v5491_v5  ;;  %5528 = vmatpush3.bf16.msra.mxu1 %v5491_v5  ;;  %v61_v29 = vld [vmem:[#allocation2 + $0xb8] sm:$0xff]  ;;  %v44_v30 = vld [vmem:[#allocation2 + $0x30] sm:$0xff]  ;;  %v62_v31 = vld [vmem:[#allocation2 + $0xc0] sm:$0xff] }
  0x1c   :  { %5496 = vmatprep.subr.bf16.mxu0 %v5495_v10  ;;  %5523 = vmatprep.subr.bf16.mxu1 %v5495_v10  ;;  %v45_v32 = vld [vmem:[#allocation2 + $0x38] sm:$0xff]  ;;  %v63_v33 = vld [vmem:[#allocation2 + $0xc8] sm:$0xff]  ;;  %v46_v34 = vld [vmem:[#allocation2 + $0x40] sm:$0xff] }
  0x1d   :  { %v64_v35 = vld [vmem:[#allocation2 + $0xd0] sm:$0xff]  ;;  %v47_v36 = vld [vmem:[#allocation2 + $0x48] sm:$0xff]  ;;  %v65_v37 = vld [vmem:[#allocation2 + $0xd8] sm:$0xff] }
  0x1e   :  { %v48_v38 = vld [vmem:[#allocation2 + $0x50] sm:$0xff]  ;;  %v66_v39 = vld [vmem:[#allocation2 + $0xe0] sm:$0xff]  ;;  %v49_v40 = vld [vmem:[#allocation2 + $0x58] sm:$0xff] }
  0x1f   :  { %5498 = vmatpush3.bf16.msra.mxu0 %v5495_v10  ;;  %5529 = vmatpush3.bf16.msra.mxu1 %v5495_v10  ;;  %v67_v41 = vld [vmem:[#allocation2 + $0xe8] sm:$0xff]  ;;  %v50_v42 = vld [vmem:[#allocation2 + $0x60] sm:$0xff]  ;;  %v68_v43 = vld [vmem:[#allocation2 + $0xf0] sm:$0xff] }
  0x20   :  { %5500 = vmatprep.subr.bf16.mxu0 %v5499_v13  ;;  %5524 = vmatprep.subr.bf16.mxu1 %v5499_v13  ;;  %v51_v44 = vld [vmem:[#allocation2 + $0x68] sm:$0xff]  ;;  %v69_v45 = vld [vmem:[#allocation2 + $0xf8] sm:$0xff]  ;;  %v52_v46 = vld [vmem:[#allocation2 + $0x70] sm:$0xff] }
  0x21   :  { %v70_v47 = vld [vmem:[#allocation2 + $0x100] sm:$0xff]  ;;  %v53_v48 = vld [vmem:[#allocation2 + $0x78] sm:$0xff]  ;;  %v71_v49 = vld [vmem:[#allocation2 + $0x108] sm:$0xff] }
  0x22   :  { %v54_v50 = vld [vmem:[#allocation2 + $0x80] sm:$0xff]  ;;  %v55_v51 = vld [vmem:[#allocation2 + $0x88] sm:$0xff]  ;;  %v5341_v11 = vld.sshfl [vmem:[%s7202_s5 + $0x10] sm:$0x1 pattern:$0x75316420] }
  0x23   :  { %5502 = vmatpush3.bf16.msra.mxu0 %v5499_v13  ;;  %5530 = vmatpush3.bf16.msra.mxu1 %v5499_v13  ;;  %v2395_v57 = vld [vmem:[%s7202_s5 + $0x8] sm:$0xff]  ;;  %v2394_v59 = vld [vmem:[%s7202_s5] sm:$0xff]  ;;  %vm5516_vm5 = vmpackc.low %vm5196_vm3, %vm5602_vm4 }
  0x24   :  { %5504 = vmatprep.subr.bf16.mxu0 %v5503_v16  ;;  %5525 = vmatprep.subr.bf16.mxu1 %v5503_v16  ;;  %v2449_v60 = vcombine.high %v2395_v57, %v2395_v57  ;;  %v2400_v61 = vcombine.high %v2394_v59, %v2394_v59  ;;  %v2456_v62 = vrot.slane %v2395_v57, %v5727_v58 }
  0x25   :  { %v2407_v0 = vrot.slane %v2394_v59, %v5727_v58 }
  0x26   :  { %v2463_v63 = vrot.slane %v2449_v60, %v5727_v58  ;;  %v2414_v1 = vrot.slane %v2400_v61, %v5727_v58  ;;  %v2464_v2 = vcombine.high %v2456_v62, %v2456_v62  ;;  %v5737_v6 = vrot.slane %v2456_v62, %v5727_v58 }
  0x27   :  { %5506 = vmatpush3.bf16.msra.mxu0 %v5503_v16  ;;  %5531 = vmatpush3.bf16.msra.mxu1 %v5503_v16  ;;  %v2415_v4 = vcombine.high %v2407_v0, %v2407_v0  ;;  %v5749_v10 = vrot.slane %v2407_v0, %v5727_v58 }
  0x28   :  { %5508 = vmatprep.subr.bf16.mxu0 %v5507_v19  ;;  %5526 = vmatprep.subr.bf16.mxu1 %v5507_v19  ;;  %v2465_v3 = vcombine.high %v2463_v63, %v2463_v63  ;;  %v2416_v5 = vcombine.high %v2414_v1, %v2414_v1  ;;  %v5740_v7 = vrot.slane %v2463_v63, %v5727_v58 }
  0x29   :  { %v5743_v8 = vrot.slane %v2464_v2, %v5727_v58  ;;  %v5755_v12 = vrot.slane %v2415_v4, %v5727_v58  ;;  %v5762_v14 = vcombine.high %v5737_v6, %v5737_v6 }
  0x2a   :  { %v5746_v9 = vrot.slane %v2465_v3, %v5727_v58  ;;  %v5758_v13 = vrot.slane %v2416_v5, %v5727_v58  ;;  %v5766_v15 = vcombine.high %v5740_v7, %v5740_v7 }
  0x2b   :  { %5510 = vmatpush3.bf16.msra.mxu0 %v5507_v19  ;;  %5532 = vmatpush3.bf16.msra.mxu1 %v5507_v19  ;;  %v5770_v16 = vcombine.high %v5743_v8, %v5743_v8 }
  0x2c   :  { %v5774_v18 = vcombine.high %v5746_v9, %v5746_v9 }
  0x2e   :  { %5426 = vmatmul.mubr.msk.f32.vlgmr.msra.gmra.mrb[0].mxu0 %vm84_vm0, %v39_v20  ;;  %5453 = vmatmul.mubr.msk.f32.vlgmr.msra.gmra.mrb[0].mxu1 %vm84_vm0, %v57_v21  ;;  %v5777_v20 = vrot.slane %v2414_v1, %v5727_v58  ;;  %v5781_v21 = vcombine.high %v5749_v10, %v5749_v10 }
  0x2f   :  { %5428 = vmatprep.mubr.msk.f32.mxu0 %vm84_vm0, %v40_v22  ;;  %5455 = vmatprep.mubr.msk.f32.mxu1 %vm84_vm0, %v58_v23  ;;  %v5784_v22 = vrot.slane %v5341_v11, %v5727_v58 }
  0x32   :  { %5429 = vmatmul.mubr.msk.f32.gmra.mrb[2].mxu0 %vm84_vm0, %v41_v24  ;;  %5456 = vmatmul.mubr.msk.f32.gmra.mrb[2].mxu1 %vm84_vm0, %v59_v25 }
  0x33   :  { %5431 = vmatprep.mubr.msk.f32.mxu0 %vm84_vm0, %v42_v26  ;;  %5458 = vmatprep.mubr.msk.f32.mxu1 %vm84_vm0, %v60_v27 }
  0x36   :  { %5432 = vmatmul.mubr.msk.f32.gmra.mrb[4].mxu0 %vm84_vm0, %v43_v28  ;;  %5459 = vmatmul.mubr.msk.f32.gmra.mrb[4].mxu1 %vm84_vm0, %v61_v29  ;;  %v5792_v29 = vcombine.high %v5755_v12, %v5755_v12 }
  0x37   :  { %5434 = vmatprep.mubr.msk.f32.mxu0 %vm84_vm0, %v44_v30  ;;  %5461 = vmatprep.mubr.msk.f32.mxu1 %vm84_vm0, %v62_v31 }
  0x3a   :  { %5435 = vmatmul.mubr.msk.f32.gmra.mrb[6].mxu0 %vm84_vm0, %v45_v32  ;;  %5462 = vmatmul.mubr.msk.f32.gmra.mrb[6].mxu1 %vm84_vm0, %v63_v33  ;;  %v5799_v32 = vcombine.high %v5758_v13, %v5758_v13 }
  0x3b   :  { %5437 = vmatprep.mubr.msk.f32.mxu0 %vm84_vm0, %v46_v34  ;;  %5464 = vmatprep.mubr.msk.f32.mxu1 %vm84_vm0, %v64_v35 }
  0x3e   :  { %5438 = vmatmul.mubr.msk.f32.gmra.mrb[8].mxu0 %vm84_vm0, %v47_v36  ;;  %5465 = vmatmul.mubr.msk.f32.gmra.mrb[8].mxu1 %vm84_vm0, %v65_v37 }
  0x3f   :  { %5440 = vmatprep.mubr.msk.f32.mxu0 %vm84_vm0, %v48_v38  ;;  %5467 = vmatprep.mubr.msk.f32.mxu1 %vm84_vm0, %v66_v39 }
  0x42   :  { %5441 = vmatmul.mubr.msk.f32.gmra.mrb[10].mxu0 %vm84_vm0, %v49_v40  ;;  %5468 = vmatmul.mubr.msk.f32.gmra.mrb[10].mxu1 %vm84_vm0, %v67_v41  ;;  %v5810_v40 = vcombine.high %v5777_v20, %v5777_v20 }
  0x43   :  { %5443 = vmatprep.mubr.msk.f32.mxu0 %vm84_vm0, %v50_v42  ;;  %5470 = vmatprep.mubr.msk.f32.mxu1 %vm84_vm0, %v68_v43 }
  0x46   :  { %5444 = vmatmul.mubr.msk.f32.gmra.mrb[12].mxu0 %vm84_vm0, %v51_v44  ;;  %5471 = vmatmul.mubr.msk.f32.gmra.mrb[12].mxu1 %vm84_vm0, %v69_v45 }
  0x47   :  { %5446 = vmatprep.mubr.msk.f32.mxu0 %vm84_vm0, %v52_v46  ;;  %5473 = vmatprep.mubr.msk.f32.mxu1 %vm84_vm0, %v70_v47 }
  0x4a   :  { %5447 = vmatmul.mubr.msk.f32.gmra.mrb[14].mxu0 %vm84_vm0, %v53_v48  ;;  %5474 = vmatmul.mubr.msk.f32.gmra.mrb[14].mxu1 %vm84_vm0, %v71_v49 }
  0x4b   :  { %5449 = vmatprep.mubr.msk.f32.mxu0 %vm84_vm0, %v54_v50 }
  0x4e   :  { %5450 = vmatmul.mubr.msk.f32.gmra.mrb[16].mxu0 %vm84_vm0, %v55_v51 }
 0x101   :  { %v5427_v17 = vpop.f32.mrb[0].mxu0  ;;  %v5454_v19 = vpop.f32.mrb[0].mxu1 }
 0x102   :  { %v505_v23 = vcombine.high %v5427_v17, %v5427_v17  ;;  %v512_v24 = vrot.slane %v5427_v17, %v5727_v58  ;;  %v1387_v25 = vcombine.high %v5454_v19, %v5454_v19  ;;  %v1394_v26 = vrot.slane %v5454_v19, %v5727_v58  ;;  %v253_v27 = vpop.f32.mrb[1].mxu0  ;;  %v5788_v28 = vpop.f32.mrb[1].mxu1 }
 0x103   :  { %v456_v30 = vcombine.high %v253_v27, %v253_v27  ;;  %v5795_v31 = vrot.slane %v253_v27, %v5727_v58 }
 0x104   :  { %v519_v33 = vrot.slane %v505_v23, %v5727_v58  ;;  %v520_v34 = vcombine.high %v512_v24, %v512_v24  ;;  %v528_v35 = vrot.slane %v512_v24, %v5727_v58  ;;  %v1401_v36 = vrot.slane %v1387_v25, %v5727_v58 }
 0x105   :  { %v1402_v37 = vcombine.high %v1394_v26, %v1394_v26  ;;  %v1410_v38 = vrot.slane %v1394_v26, %v5727_v58  ;;  %v5806_v39 = vrot.slane %v456_v30, %v5727_v58  ;;  %v5812_v41 = vpop.f32.mrb[2].mxu0  ;;  %v5814_v42 = vpop.f32.mrb[2].mxu1  ;;  %v471_v52 = vcombine.high %v5795_v31, %v5795_v31 }
 0x106   :  { %v521_v43 = vcombine.high %v519_v33, %v519_v33  ;;  %v535_v44 = vrot.slane %v519_v33, %v5727_v58  ;;  %v542_v45 = vrot.slane %v520_v34, %v5727_v58  ;;  %v550_v46 = vcombine.high %v528_v35, %v528_v35  ;;  %v5818_v47 = vpop.f32.mrb[3].mxu0  ;;  %v5820_v48 = vpop.f32.mrb[3].mxu1 }
 0x107   :  { %v1403_v49 = vcombine.high %v1401_v36, %v1401_v36  ;;  %v1417_v50 = vrot.slane %v1401_v36, %v5727_v58  ;;  %v1424_v51 = vrot.slane %v1402_v37, %v5727_v58  ;;  %v2537_v57 = vadd.f32 %v5737_v6, %v528_v35 }
 0x108   :  { %v549_v53 = vrot.slane %v521_v43, %v5727_v58  ;;  %v551_v54 = vcombine.high %v535_v44, %v535_v44  ;;  %v552_v55 = vcombine.high %v542_v45, %v542_v45  ;;  %v2538_v56 = vadd.f32 %v5743_v8, %v542_v45 }
 0x109   :  { %v2539_v59 = vadd.f32 %v5762_v14, %v550_v46  ;;  %v2541_v60 = vadd.f32 %v5740_v7, %v535_v44  ;;  %v1432_v61 = vcombine.high %v1410_v38, %v1410_v38  ;;  %v5831_v62 = vpop.f32.mrb[4].mxu0  ;;  %v5833_v63 = vpop.f32.mrb[4].mxu1  ;;  %v5838_v3 = vrot.slane %v1403_v49, %v5727_v58 }
 0x10a   :  { %v553_v0 = vcombine.high %v549_v53, %v549_v53  ;;  %v2540_v1 = vadd.f32 %v5770_v16, %v552_v55  ;;  %v2542_v2 = vadd.f32 %v5746_v9, %v549_v53  ;;  %v5840_v4 = vpop.f32.mrb[5].mxu0  ;;  %v5842_v5 = vpop.f32.mrb[5].mxu1  ;;  %v2543_v11 = vadd.f32 %v5766_v15, %v551_v54 }
 0x10b   :  { %v3122_v17 = vcombine.low %v2537_v57, %v2538_v56  ;;  %v1433_v19 = vcombine.high %v1417_v50, %v1417_v50  ;;  %v1434_v23 = vcombine.high %v1424_v51, %v1424_v51  ;;  %v2681_v27 = vadd.f32 %v5784_v22, %v1410_v38 }
 0x10c   :  { %v2544_v24 = vadd.f32 %v5774_v18, %v553_v0  ;;  %v3123_v25 = vcombine.low %v2539_v59, %v2540_v1  ;;  %v3124_v26 = vcombine.low %v2541_v60, %v2542_v2  ;;  %v2682_v33 = vadd.f32 %v5749_v10, %v1424_v51 }
 0x10d   :  { %v3132_v30 = vrot.slane %v3122_v17, %v5727_v58  ;;  %v2683_v34 = vadd.f32 %v5755_v12, %v1432_v61  ;;  %v2684_v35 = vadd.f32 %v5781_v21, %v1434_v23  ;;  %v5851_v36 = vpop.f32.mrb[6].mxu0  ;;  %v5853_v37 = vpop.f32.mrb[6].mxu1  ;;  %v2685_v46 = vadd.f32 %v5792_v29, %v1417_v50 }
 0x10e   :  { %v3125_v43 = vcombine.low %v2543_v11, %v2544_v24  ;;  %v3139_v44 = vrot.slane %v3123_v25, %v5727_v58  ;;  %v3146_v45 = vrot.slane %v3124_v26, %v5727_v58  ;;  %v5858_v38 = vpop.f32.mrb[7].mxu0  ;;  %v5860_v49 = vpop.f32.mrb[7].mxu1  ;;  %v5864_v51 = vadd.f32 %v5777_v20, %v5838_v3 }
 0x10f   :  { %7217 = vst [vmem:[#allocation8_spill] sm:$0xff] %v5860_v49  ;;  %v5867_v53 = vadd.f32 %v5758_v13, %v1433_v19  ;;  %v4073_v54 = vrot.slane %v2681_v27, %v5727_v58  ;;  %v4081_v55 = vcombine.low %v2682_v33, %v2683_v34  ;;  %v4082_v59 = vcombine.low %v2684_v35, %v2685_v46 }
 0x110   :  { %v3153_v56 = vrot.slane %v3125_v43, %v5727_v58  ;;  %v3154_v57 = vcombine.low %v3132_v30, %v3139_v44  ;;  %v472_v50 = vcombine.high %v5806_v39, %v5806_v39  ;;  %v479_v61 = vrot.slane %v5795_v31, %v5727_v58 }
 0x111   :  { %v4080_v60 = vrot.slane %v4073_v54, %v5727_v58  ;;  %v1338_v0 = vcombine.high %v5788_v28, %v5788_v28  ;;  %v1345_v1 = vrot.slane %v5788_v28, %v5727_v58  ;;  %v5880_v2 = vpop.f32.mrb[8].mxu0  ;;  %v5883_v17 = vrot.slane %v4081_v55, %v5727_v58  ;;  %v5902_v34 = vpop.f32.mrb[8].mxu1 }
 0x112   :  { %7218 = vst [vmem:[#allocation9_spill] sm:$0xff] %v5880_v2  ;;  %v3155_v11 = vcombine.low %v3146_v45, %v3153_v56  ;;  %v5886_v19 = vrot.slane %v4082_v59, %v5727_v58  ;;  %v486_v23 = vrot.slane %v5806_v39, %v5727_v58  ;;  %v493_v24 = vrot.slane %v471_v52, %v5727_v58 }
 0x113   :  { %v500_v25 = vrot.slane %v472_v50, %v5727_v58  ;;  %v501_v28 = vcombine.high %v479_v61, %v479_v61  ;;  %v5895_v26 = vrot.slane %v3154_v57, %v5727_v58  ;;  %v5900_v30 = vsel %vm4917_vm1, %v4080_v60, -inf  ;;  %7220 = vst [vmem:[#allocation11_spill] sm:$0xff] %v5902_v34 }
 0x114   :  { %7219 = vst [vmem:[#allocation10_spill] sm:$0xff] %v5900_v30  ;;  %v502_v33 = vcombine.high %v486_v23, %v486_v23  ;;  %v5905_v39 = vrot.slane %v3155_v11, %v5727_v58  ;;  %v503_v35 = vcombine.high %v493_v24, %v493_v24  ;;  %v2530_v43 = vadd.f32 %v5755_v12, %v493_v24 }
 0x115   :  { %v504_v52 = vcombine.high %v500_v25, %v500_v25  ;;  %v2529_v45 = vadd.f32 %v5749_v10, %v479_v61  ;;  %v2533_v46 = vadd.f32 %v5777_v20, %v486_v23  ;;  %v2534_v54 = vadd.f32 %v5758_v13, %v500_v25 }
 0x116   :  { %v2531_v55 = vadd.f32 %v5781_v21, %v501_v28  ;;  %v2532_v56 = vadd.f32 %v5792_v29, %v503_v35  ;;  %v2535_v57 = vadd.f32 %v5810_v40, %v502_v33  ;;  %v1352_v60 = vrot.slane %v1338_v0, %v5727_v58 }
 0x117   :  { %v2536_v59 = vadd.f32 %v5799_v32, %v504_v52  ;;  %v3075_v50 = vcombine.low %v2533_v46, %v2534_v54  ;;  %v1353_v11 = vcombine.high %v1345_v1, %v1345_v1  ;;  %v1361_v24 = vrot.slane %v1345_v1, %v5727_v58 }
 0x118   :  { %v3073_v27 = vcombine.low %v2529_v45, %v2530_v43  ;;  %v3074_v61 = vcombine.low %v2531_v55, %v2532_v56  ;;  %v603_v23 = vcombine.high %v5812_v41, %v5812_v41  ;;  %v1354_v28 = vcombine.high %v1352_v60, %v1352_v60 }
 0x119   :  { %v3076_v31 = vcombine.low %v2535_v57, %v2536_v59  ;;  %v3097_v25 = vrot.slane %v3075_v50, %v5727_v58  ;;  %v1368_v35 = vrot.slane %v1352_v60, %v5727_v58  ;;  %v1375_v33 = vrot.slane %v1353_v11, %v5727_v58  ;;  %v5932_v60 = vpop.f32.mrb[9].mxu0 }
 0x11a   :  { %v3090_v52 = vrot.slane %v3074_v61, %v5727_v58  ;;  %v1383_v46 = vcombine.high %v1361_v24, %v1361_v24  ;;  %v2673_v1 = vadd.f32 %v5737_v6, %v1361_v24  ;;  %v1382_v43 = vrot.slane %v1354_v28, %v5727_v58  ;;  %7221 = vst [vmem:[#allocation12_spill] sm:$0xff] %v5932_v60  ;;  %v6033_v2 = vpop.f32.mrb[10].mxu0 }
 0x11b   :  { %v3104_v0 = vrot.slane %v3076_v31, %v5727_v58  ;;  %v1384_v45 = vcombine.high %v1368_v35, %v1368_v35  ;;  %v1385_v54 = vcombine.high %v1375_v33, %v1375_v33  ;;  %v2674_v55 = vadd.f32 %v5743_v8, %v1375_v33  ;;  %7225 = vst [vmem:[#allocation15_spill] sm:$0xff] %v6033_v2 }
 0x11c   :  { %v3083_v56 = vrot.slane %v3073_v27, %v5727_v58  ;;  %v2675_v59 = vadd.f32 %v5762_v14, %v1383_v46  ;;  %v2677_v50 = vadd.f32 %v5740_v7, %v1368_v35  ;;  %v1386_v11 = vcombine.high %v1382_v43, %v1382_v43 }
 0x11d   :  { %v3106_v57 = vcombine.low %v3097_v25, %v3104_v0  ;;  %v2676_v31 = vadd.f32 %v5770_v16, %v1385_v54  ;;  %v2678_v24 = vadd.f32 %v5746_v9, %v1382_v43  ;;  %v2679_v61 = vadd.f32 %v5766_v15, %v1384_v45 }
 0x11e   :  { %v3105_v33 = vcombine.low %v3083_v56, %v3090_v52  ;;  %v4018_v44 = vcombine.low %v2673_v1, %v2674_v55  ;;  %v610_v27 = vrot.slane %v5812_v41, %v5727_v58  ;;  %v2680_v25 = vadd.f32 %v5774_v18, %v1386_v11 }
 0x11f   :  { %v4019_v35 = vcombine.low %v2675_v59, %v2676_v31  ;;  %v4020_v0 = vcombine.low %v2677_v50, %v2678_v24  ;;  %v617_v46 = vrot.slane %v603_v23, %v5727_v58  ;;  %v5944_v54 = vrot.slane %v3106_v57, %v5727_v58 }
 0x120   :  { %v4028_v43 = vrot.slane %v4018_v44, %v5727_v58  ;;  %v618_v45 = vcombine.high %v610_v27, %v610_v27  ;;  %v626_v30 = vrot.slane %v610_v27, %v5727_v58  ;;  %v4021_v28 = vcombine.low %v2679_v61, %v2680_v25 }
 0x121   :  { %v4035_v52 = vrot.slane %v4019_v35, %v5727_v58  ;;  %v4042_v1 = vrot.slane %v4020_v0, %v5727_v58  ;;  %v619_v41 = vcombine.high %v617_v46, %v617_v46  ;;  %v5951_v55 = vrot.slane %v3105_v33, %v5727_v58 }
 0x122   :  { %v633_v56 = vrot.slane %v617_v46, %v5727_v58  ;;  %v640_v23 = vrot.slane %v618_v45, %v5727_v58  ;;  %v648_v57 = vcombine.high %v626_v30, %v626_v30  ;;  %v4049_v59 = vrot.slane %v4021_v28, %v5727_v58 }
 0x123   :  { %v4050_v44 = vcombine.low %v4028_v43, %v4035_v52  ;;  %v5957_v50 = vrot.slane %v619_v41, %v5727_v58  ;;  %v1485_v11 = vcombine.high %v5814_v42, %v5814_v42  ;;  %v7222_v27 = vcombine.low %v5883_v17, %v5886_v19  ;;  %v5980_v17 = vpop.f32.mrb[9].mxu1 }
 0x124   :  { %v649_v31 = vcombine.high %v633_v56, %v633_v56  ;;  %v650_v24 = vcombine.high %v640_v23, %v640_v23  ;;  %v2554_v61 = vadd.f32 %v5737_v6, %v640_v23  ;;  %v2555_v33 = vadd.f32 %v5743_v8, %v648_v57  ;;  %7223 = vst [vmem:[#allocation13_spill] sm:$0xff] %v5980_v17 }
 0x125   :  { %v5967_v25 = vrot.slane %v7222_v27, %v5727_v58  ;;  %v4051_v35 = vcombine.low %v4042_v1, %v4049_v59  ;;  %v5972_v0 = vadd.f32 %v5799_v32, %v626_v30  ;;  %v2557_v43 = vadd.f32 %v5770_v16, %v633_v56 }
 0x126   :  { %v2556_v46 = vadd.f32 %v5762_v14, %v650_v24  ;;  %v5978_v45 = vadd.f32 %v5740_v7, %v5957_v50  ;;  %v3234_v52 = vcombine.low %v2554_v61, %v2555_v33  ;;  %v5983_v19 = vadd.f32 %v5746_v9, %v649_v31 }
 0x127   :  { %v1492_v1 = vrot.slane %v5814_v42, %v5727_v58  ;;  %v1499_v30 = vrot.slane %v1485_v11, %v5727_v58  ;;  %v554_v41 = vcombine.high %v5818_v47, %v5818_v47  ;;  %v4058_v56 = vrot.slane %v4050_v44, %v5727_v58 }
 0x128   :  { %v4065_v23 = vrot.slane %v4051_v35, %v5727_v58  ;;  %v3235_v57 = vcombine.low %v2556_v46, %v2557_v43  ;;  %v561_v59 = vrot.slane %v5818_v47, %v5727_v58  ;;  %v3244_v11 = vrot.slane %v3234_v52, %v5727_v58 }
 0x129   :  { %v1500_v24 = vcombine.high %v1492_v1, %v1492_v1  ;;  %v1501_v61 = vcombine.high %v1499_v30, %v1499_v30  ;;  %v1508_v42 = vrot.slane %v1492_v1, %v5727_v58  ;;  %v1515_v27 = vrot.slane %v1499_v30, %v5727_v58 }
 0x12a   :  { %v3251_v33 = vrot.slane %v3235_v57, %v5727_v58  ;;  %v568_v44 = vrot.slane %v554_v41, %v5727_v58  ;;  %v4066_v31 = vcombine.low %v4058_v56, %v4065_v23  ;;  %v569_v1 = vcombine.high %v561_v59, %v561_v59 }
 0x12b   :  { %v1522_v47 = vrot.slane %v1500_v24, %v5727_v58  ;;  %v1529_v46 = vrot.slane %v1501_v61, %v5727_v58  ;;  %v1530_v43 = vcombine.high %v1508_v42, %v1508_v42  ;;  %v1531_v17 = vcombine.high %v1515_v27, %v1515_v27 }
 0x12c   :  { %v3266_v28 = vcombine.low %v3244_v11, %v3251_v33  ;;  %v2701_v30 = vadd.f32 %v5781_v21, %v1515_v27  ;;  %v570_v24 = vcombine.high %v568_v44, %v568_v44  ;;  %v577_v11 = vrot.slane %v561_v59, %v5727_v58 }
 0x12d   :  { %v1532_v60 = vcombine.high %v1522_v47, %v1522_v47  ;;  %v1533_v52 = vcombine.high %v1529_v46, %v1529_v46  ;;  %v2698_v57 = vadd.f32 %v5784_v22, %v1522_v47  ;;  %v2699_v41 = vadd.f32 %v5749_v10, %v1530_v43 }
 0x12e   :  { %v2702_v34 = vadd.f32 %v5792_v29, %v1529_v46  ;;  %v6010_v35 = vadd.f32 %v5777_v20, %v1531_v17  ;;  %v6019_v33 = vsel %vm4913_vm2, %v4066_v31, -inf  ;;  %v584_v27 = vrot.slane %v568_v44, %v5727_v58 }
 0x12f   :  { %v2700_v61 = vadd.f32 %v5755_v12, %v1532_v60  ;;  %v6014_v56 = vadd.f32 %v5758_v13, %v1533_v52  ;;  %v4185_v23 = vrot.slane %v2698_v57, %v5727_v58  ;;  %7224 = vst [vmem:[#allocation14_spill] sm:$0xff] %v6019_v33  ;;  %v591_v47 = vrot.slane %v569_v1, %v5727_v58 }
 0x130   :  { %v598_v17 = vrot.slane %v570_v24, %v5727_v58  ;;  %v6025_v46 = vrot.slane %v3266_v28, %v5727_v58  ;;  %v6028_v60 = vadd.f32 %v5774_v18, %v1508_v42  ;;  %v4194_v43 = vcombine.low %v2701_v30, %v2702_v34 }
 0x131   :  { %v599_v52 = vcombine.high %v577_v11, %v577_v11  ;;  %v6031_v57 = vrot.slane %v4185_v23, %v5727_v58  ;;  %v600_v59 = vcombine.high %v584_v27, %v584_v27  ;;  %v601_v31 = vcombine.high %v591_v47, %v591_v47 }
 0x132   :  { %v602_v33 = vcombine.high %v598_v17, %v598_v17  ;;  %v4193_v44 = vcombine.low %v2699_v41, %v2700_v61  ;;  %v2545_v28 = vadd.f32 %v5784_v22, %v577_v11  ;;  %v2546_v24 = vadd.f32 %v5749_v10, %v591_v47 }
 0x133   :  { %v2547_v42 = vadd.f32 %v5755_v12, %v599_v52  ;;  %v2548_v34 = vadd.f32 %v5781_v21, %v601_v31  ;;  %v2549_v30 = vadd.f32 %v5792_v29, %v584_v27  ;;  %v2550_v23 = vadd.f32 %v5777_v20, %v598_v17 }
 0x134   :  { %v6044_v49 = vrot.slane %v4194_v43, %v5727_v58  ;;  %v2551_v41 = vadd.f32 %v5758_v13, %v600_v59  ;;  %v2552_v61 = vadd.f32 %v5810_v40, %v602_v33  ;;  %v3177_v1 = vrot.slane %v2545_v28, %v5727_v58 }
 0x135   :  { %v3185_v11 = vcombine.low %v2546_v24, %v2547_v42  ;;  %v3186_v2 = vcombine.low %v2548_v34, %v2549_v30  ;;  %v7226_v47 = vcombine.low %v5951_v55, %v5944_v54  ;;  %v7227_v27 = vcombine.low %v5895_v26, %v5905_v39  ;;  %v6071_v42 = vpop.f32.mrb[10].mxu1 }
 0x136   :  { %v6058_v43 = vrot.slane %v4193_v44, %v5727_v58  ;;  %v3184_v59 = vrot.slane %v3177_v1, %v5727_v58  ;;  %v3187_v33 = vcombine.low %v2550_v23, %v2551_v41  ;;  %v3188_v31 = vcombine.low %v2552_v61, %v5972_v0 }
 0x137   :  { %v4914_v52 = vsel %vm4913_vm2, %v7226_v47, -inf  ;;  %v4915_v17 = vsel %vm4913_vm2, %v7227_v27, -inf  ;;  %v3195_v28 = vrot.slane %v3185_v11, %v5727_v58  ;;  %v3202_v24 = vrot.slane %v3186_v2, %v5727_v58 }
 0x138   :  { %v4916_v54 = vmax.f32 %v4914_v52, %v4915_v17  ;;  %v1436_v55 = vcombine.high %v5820_v48, %v5820_v48  ;;  %v3209_v26 = vrot.slane %v3187_v33, %v5727_v58  ;;  %v3216_v39 = vrot.slane %v3188_v31, %v5727_v58 }
 0x139   :  { %v4918_v44 = vsel %vm4917_vm1, %v3184_v59, -inf  ;;  %v1443_v1 = vrot.slane %v5820_v48, %v5727_v58  ;;  %v3217_v0 = vcombine.low %v3195_v28, %v3202_v24  ;;  %v7228_v2 = vcombine.high %v5838_v3, %v5838_v3 }
 0x13a   :  { %v4919_v34 = vmax.f32 %v4916_v54, %v4918_v44  ;;  %v1450_v30 = vrot.slane %v1436_v55, %v5727_v58  ;;  %v3218_v41 = vcombine.low %v3209_v26, %v3216_v39  ;;  %v7229_v47 = vcombine.low %v5864_v51, %v5867_v53 }
 0x13b   :  { %v2688_v23 = vadd.f32 %v5810_v40, %v7228_v2  ;;  %v1451_v61 = vcombine.high %v1443_v1, %v1443_v1  ;;  %v1459_v11 = vrot.slane %v1443_v1, %v5727_v58  ;;  %v6084_v52 = vrot.slane %v3217_v0, %v5727_v58 }
 0x13c   :  { %v4105_v48 = vrot.slane %v7229_v47, %v5727_v58  ;;  %v4920_v27 = vrot.slane %v4919_v34, 4  ;;  %v1452_v17 = vcombine.high %v1450_v30, %v1450_v30  ;;  %v1466_v59 = vrot.slane %v1450_v30, %v5727_v58 }
 0x13d   :  { %v6088_v3 = vrot.slane %v3218_v41, %v5727_v58  ;;  %v1473_v33 = vrot.slane %v1451_v61, %v5727_v58  ;;  %v1481_v31 = vcombine.high %v1459_v11, %v1459_v11  ;;  %v2689_v28 = vadd.f32 %v5799_v32, %v1459_v11 }
 0x13e   :  { %v4921_v24 = vmax.f32 %v4919_v34, %v4920_v27  ;;  %v1480_v54 = vrot.slane %v1452_v17, %v5727_v58  ;;  %v1482_v51 = vcombine.high %v1466_v59, %v1466_v59  ;;  %v2693_v53 = vadd.f32 %v5770_v16, %v1466_v59  ;;  %v6100_v34 = vpop.f32.mrb[11].mxu0 }
 0x13f   :  { %v1483_v26 = vcombine.high %v1473_v33, %v1473_v33  ;;  %v2690_v39 = vadd.f32 %v5737_v6, %v1473_v33  ;;  %v2691_v44 = vadd.f32 %v5743_v8, %v1481_v31  ;;  %v4084_v61 = vcombine.low %v2688_v23, %v2689_v28 }
 0x140   :  { %v4922_v1 = vrot.slane %v4921_v24, 2  ;;  %v1484_v0 = vcombine.high %v1480_v54, %v1480_v54  ;;  %v2694_v30 = vadd.f32 %v5740_v7, %v1480_v54  ;;  %v2695_v2 = vadd.f32 %v5746_v9, %v1482_v51 }
 0x141   :  { %v2692_v41 = vadd.f32 %v5762_v14, %v1483_v26  ;;  %v4130_v11 = vcombine.low %v2690_v39, %v2691_v44  ;;  %v701_v47 = vcombine.high %v5831_v62, %v5831_v62  ;;  %v708_v33 = vrot.slane %v5831_v62, %v5727_v58 }
 0x142   :  { %v4923_v27 = vmax.f32 %v4921_v24, %v4922_v1  ;;  %v2696_v17 = vadd.f32 %v5766_v15, %v1484_v0  ;;  %v4132_v59 = vcombine.low %v2694_v30, %v2695_v2  ;;  %v4112_v31 = vrot.slane %v4084_v61, %v5727_v58  ;;  %v5342_v24 = vld [vmem:[%s7199_s2] ss:$0 sm:$0xff] }
 0x143   :  { %v4131_v54 = vcombine.low %v2692_v41, %v2693_v53  ;;  %v4140_v51 = vrot.slane %v4130_v11, %v5727_v58  ;;  %v715_v55 = vrot.slane %v701_v47, %v5727_v58  ;;  %v716_v39 = vcombine.high %v708_v33, %v708_v33 }
 0x144   :  { %v4924_v26 = vrot.slane %v4923_v27, 1  ;;  %v4133_v23 = vcombine.low %v2696_v17, %v6028_v60  ;;  %v4154_v28 = vrot.slane %v4132_v59, %v5727_v58  ;;  %v4114_v44 = vcombine.low %v4105_v48, %v4112_v31 }
 0x145   :  { %v4147_v62 = vrot.slane %v4131_v54, %v5727_v58  ;;  %v717_v1 = vcombine.high %v715_v55, %v715_v55  ;;  %v724_v53 = vrot.slane %v708_v33, %v5727_v58  ;;  %v731_v2 = vrot.slane %v715_v55, %v5727_v58 }
 0x146   :  { %v4925_v0 = vmax.f32 %v4923_v27, %v4924_v26  ;;  %v4161_v30 = vrot.slane %v4133_v23, %v5727_v58  ;;  %v738_v60 = vrot.slane %v716_v39, %v5727_v58  ;;  %v4128_v41 = vrot.slane %v4114_v44, %v5727_v58  ;;  %v6182_v44 = vpop.f32.mrb[12].mxu0 }
 0x147   :  { %v4162_v61 = vcombine.low %v4140_v51, %v4147_v62  ;;  %v745_v11 = vrot.slane %v717_v1, %v5727_v58  ;;  %v746_v47 = vcombine.high %v724_v53, %v724_v53  ;;  %v4225_v48 = vcombine.low %v6058_v43, %v6044_v49 }
 0x148   :  { %v6125_v17 = vadd.f32 %v5342_v24, %v4925_v0  ;;  %v4163_v59 = vcombine.low %v4154_v28, %v4161_v30  ;;  %v748_v33 = vcombine.high %v738_v60, %v738_v60  ;;  %v5017_v27 = vsel %vm4917_vm1, %v6031_v57, -inf  ;;  %v6138_v24 = vpop.f32.mrb[11].mxu1 }
 0x149   :  { %v4129_v55 = vcombine.low %v5967_v25, %v4128_v41  ;;  %v4170_v31 = vrot.slane %v4162_v61, %v5727_v58  ;;  %v747_v54 = vcombine.high %v731_v2, %v731_v2  ;;  %v749_v26 = vcombine.high %v745_v11, %v745_v11 }
 0x14a   :  { %7230 = vst [vmem:[#allocation16_spill] sm:$0xff] %v6125_v17  ;;  %v4177_v51 = vrot.slane %v4163_v59, %v5727_v58  ;;  %v2569_v23 = vadd.f32 %v5810_v40, %v724_v53  ;;  %v2570_v39 = vadd.f32 %v5799_v32, %v738_v60  ;;  %v2571_v49 = vadd.f32 %v5737_v6, %v746_v47 }
 0x14b   :  { %v2572_v43 = vadd.f32 %v5743_v8, %v748_v33  ;;  %v2573_v28 = vadd.f32 %v5762_v14, %v731_v2  ;;  %v2574_v57 = vadd.f32 %v5770_v16, %v745_v11  ;;  %v6141_v25 = vrot.slane %v4225_v48, %v5727_v58 }
 0x14c   :  { %v4178_v62 = vcombine.low %v4170_v31, %v4177_v51  ;;  %v3300_v1 = vcombine.low %v2569_v23, %v2570_v39  ;;  %v1583_v30 = vcombine.high %v5833_v63, %v5833_v63  ;;  %v1590_v60 = vrot.slane %v5833_v63, %v5727_v58 }
 0x14d   :  { %v3346_v53 = vcombine.low %v2571_v49, %v2572_v43  ;;  %v3347_v0 = vcombine.low %v2573_v28, %v2574_v57  ;;  %v5014_v2 = vsel %vm4913_vm2, %v4129_v55, -inf  ;;  %v6151_v61 = vadd.f32 %v5740_v7, %v747_v54 }
 0x14e   :  { %v5015_v41 = vsel %vm4913_vm2, %v4178_v62, -inf  ;;  %v652_v11 = vcombine.high %v5840_v4, %v5840_v4  ;;  %v6156_v48 = vadd.f32 %v5746_v9, %v749_v26  ;;  %v6159_v59 = vrot.slane %v3300_v1, %v5727_v58 }
 0x14f   :  { %v5016_v47 = vmax.f32 %v5014_v2, %v5015_v41  ;;  %v1597_v33 = vrot.slane %v1583_v30, %v5727_v58  ;;  %v3356_v63 = vrot.slane %v3346_v53, %v5727_v58  ;;  %v1598_v55 = vcombine.high %v1590_v60, %v1590_v60 }
 0x150   :  { %v1606_v31 = vrot.slane %v1590_v60, %v5727_v58  ;;  %v659_v54 = vrot.slane %v5840_v4, %v5727_v58  ;;  %v3363_v23 = vrot.slane %v3347_v0, %v5727_v58  ;;  %v666_v57 = vrot.slane %v652_v11, %v5727_v58 }
 0x151   :  { %v5018_v51 = vmax.f32 %v5016_v47, %v5017_v27  ;;  %v1599_v39 = vcombine.high %v1597_v33, %v1597_v33  ;;  %v1613_v26 = vrot.slane %v1597_v33, %v5727_v58  ;;  %v1620_v49 = vrot.slane %v1598_v55, %v5727_v58 }
 0x152   :  { %v1628_v43 = vcombine.high %v1606_v31, %v1606_v31  ;;  %v2713_v28 = vadd.f32 %v5766_v15, %v1606_v31  ;;  %v667_v30 = vcombine.high %v659_v54, %v659_v54  ;;  %v3378_v41 = vcombine.low %v3356_v63, %v3363_v23 }
 0x153   :  { %v5019_v62 = vrot.slane %v5018_v51, 4  ;;  %v6172_v1 = vrot.slane %v1599_v39, %v5727_v58  ;;  %v1629_v53 = vcombine.high %v1613_v26, %v1613_v26  ;;  %v1630_v4 = vcombine.high %v1620_v49, %v1620_v49 }
 0x154   :  { %v2714_v27 = vadd.f32 %v5774_v18, %v1620_v49  ;;  %v2715_v0 = vadd.f32 %v5784_v22, %v1628_v43  ;;  %v2717_v60 = vadd.f32 %v5755_v12, %v1613_v26  ;;  %v668_v39 = vcombine.high %v666_v57, %v666_v57 }
 0x155   :  { %v5020_v2 = vmax.f32 %v5018_v51, %v5019_v62  ;;  %v2718_v47 = vadd.f32 %v5781_v21, %v6172_v1  ;;  %v2719_v11 = vadd.f32 %v5792_v29, %v1629_v53  ;;  %v2716_v33 = vadd.f32 %v5749_v10, %v1630_v4 }
 0x156   :  { %v4245_v55 = vcombine.low %v2713_v28, %v2714_v27  ;;  %v4297_v31 = vrot.slane %v2715_v0, %v5727_v58  ;;  %v675_v43 = vrot.slane %v659_v54, %v5727_v58  ;;  %v682_v51 = vrot.slane %v666_v57, %v5727_v58 }
 0x157   :  { %v5021_v49 = vrot.slane %v5020_v2, 2  ;;  %v4306_v17 = vcombine.low %v2718_v47, %v2719_v11  ;;  %v4305_v26 = vcombine.low %v2716_v33, %v2717_v60  ;;  %v689_v62 = vrot.slane %v667_v30, %v5727_v58 }
 0x158   :  { %v4304_v23 = vrot.slane %v4297_v31, %v5727_v58  ;;  %v6193_v53 = vrot.slane %v3378_v41, %v5727_v58  ;;  %v696_v4 = vrot.slane %v668_v39, %v5727_v58  ;;  %v697_v27 = vcombine.high %v675_v43, %v675_v43 }
 0x159   :  { %v6190_v28 = vmax.f32 %v5020_v2, %v5021_v49  ;;  %v6199_v57 = vrot.slane %v4245_v55, %v5727_v58  ;;  %v698_v0 = vcombine.high %v682_v51, %v682_v51  ;;  %v699_v47 = vcombine.high %v689_v62, %v689_v62 }
 0x15a   :  { %v6202_v60 = vrot.slane %v4306_v17, %v5727_v58  ;;  %v700_v30 = vcombine.high %v696_v4, %v696_v4  ;;  %v7231_v2 = vcombine.high %v5957_v50, %v5957_v50  ;;  %v2561_v11 = vadd.f32 %v5774_v18, %v675_v43 }
 0x15b   :  { %v6210_v33 = vrot.slane %v4305_v26, %v5727_v58  ;;  %v6213_v31 = vsel %vm4917_vm1, %v4304_v23, -inf  ;;  %v2562_v55 = vadd.f32 %v5784_v22, %v689_v62  ;;  %v2564_v39 = vadd.f32 %v5755_v12, %v699_v47 }
 0x15c   :  { %v2560_v41 = vadd.f32 %v5766_v15, %v7231_v2  ;;  %v2563_v49 = vadd.f32 %v5749_v10, %v697_v27  ;;  %v2565_v50 = vadd.f32 %v5781_v21, %v682_v51  ;;  %v2566_v2 = vadd.f32 %v5792_v29, %v696_v4 }
 0x15d   :  { %v2567_v43 = vadd.f32 %v5777_v20, %v698_v0  ;;  %v2568_v26 = vadd.f32 %v5758_v13, %v700_v30  ;;  %v7232_v23 = vcombine.low %v5978_v45, %v5983_v19  ;;  %v3289_v47 = vrot.slane %v2562_v55, %v5727_v58  ;;  %v6237_v45 = vpop.f32.mrb[12].mxu1 }
 0x15e   :  { %v3237_v54 = vcombine.low %v2560_v41, %v2561_v11  ;;  %v3297_v63 = vcombine.low %v2563_v49, %v2564_v39  ;;  %v3298_v17 = vcombine.low %v2565_v50, %v2566_v2  ;;  %v7233_v27 = vcombine.low %v6084_v52, %v6088_v3 }
 0x15f   :  { %v3258_v62 = vrot.slane %v7232_v23, %v5727_v58  ;;  %v3299_v0 = vcombine.low %v2567_v43, %v2568_v26  ;;  %v1534_v30 = vcombine.high %v5842_v5, %v5842_v5  ;;  %v1541_v41 = vrot.slane %v5842_v5, %v5727_v58 }
 0x160   :  { %v4926_v51 = vsel %vm4913_vm2, %v7233_v27, -inf  ;;  %v3265_v4 = vrot.slane %v3237_v54, %v5727_v58  ;;  %v3296_v19 = vrot.slane %v3289_v47, %v5727_v58  ;;  %v3307_v11 = vrot.slane %v3297_v63, %v5727_v58 }
 0x161   :  { %v3314_v55 = vrot.slane %v3298_v17, %v5727_v58  ;;  %v7234_v52 = vcombine.low %v6010_v35, %v6014_v56  ;;  %v3321_v39 = vrot.slane %v3299_v0, %v5727_v58  ;;  %v1548_v49 = vrot.slane %v1534_v30, %v5727_v58 }
 0x162   :  { %v3267_v54 = vcombine.low %v3258_v62, %v3265_v4  ;;  %v1549_v50 = vcombine.high %v1541_v41, %v1541_v41  ;;  %v4929_v2 = vsel %vm4917_vm1, %v3296_v19, -inf  ;;  %v1557_v43 = vrot.slane %v1541_v41, %v5727_v58 }
 0x163   :  { %v4217_v3 = vrot.slane %v7234_v52, %v5727_v58  ;;  %v3329_v5 = vcombine.low %v3307_v11, %v3314_v55  ;;  %v799_v63 = vcombine.high %v5851_v36, %v5851_v36  ;;  %v3330_v26 = vcombine.low %v3321_v39, %v6159_v59 }
 0x164   :  { %v3281_v17 = vrot.slane %v3267_v54, %v5727_v58  ;;  %v1550_v35 = vcombine.high %v1548_v49, %v1548_v49  ;;  %v1564_v56 = vrot.slane %v1548_v49, %v5727_v58  ;;  %v1571_v62 = vrot.slane %v1549_v50, %v5727_v58  ;;  %v6272_v49 = vpop.f32.mrb[13].mxu0 }
 0x165   :  { %v6256_v23 = vrot.slane %v3329_v5, %v5727_v58  ;;  %v1579_v47 = vcombine.high %v1557_v43, %v1557_v43  ;;  %v2705_v27 = vadd.f32 %v5810_v40, %v1557_v43  ;;  %v6262_v0 = vrot.slane %v3330_v26, %v5727_v58 }
 0x166   :  { %v3282_v4 = vcombine.low %v6025_v46, %v3281_v17  ;;  %v1578_v30 = vrot.slane %v1550_v35, %v5727_v58  ;;  %v1580_v41 = vcombine.high %v1564_v56, %v1564_v56  ;;  %v1581_v59 = vcombine.high %v1571_v62, %v1571_v62 }
 0x167   :  { %v2706_v19 = vadd.f32 %v5799_v32, %v1571_v62  ;;  %v2707_v11 = vadd.f32 %v5737_v6, %v1579_v47  ;;  %v2709_v55 = vadd.f32 %v5762_v14, %v1564_v56  ;;  %v806_v56 = vrot.slane %v5851_v36, %v5727_v58 }
 0x168   :  { %v4927_v54 = vsel %vm4913_vm2, %v3282_v4, -inf  ;;  %v1582_v39 = vcombine.high %v1578_v30, %v1578_v30  ;;  %v2710_v46 = vadd.f32 %v5770_v16, %v1578_v30  ;;  %v2708_v5 = vadd.f32 %v5743_v8, %v1581_v59 }
 0x169   :  { %v4928_v50 = vmax.f32 %v4926_v51, %v4927_v54  ;;  %v2711_v43 = vadd.f32 %v5740_v7, %v1580_v41  ;;  %v4196_v17 = vcombine.low %v2705_v27, %v2706_v19  ;;  %v813_v62 = vrot.slane %v799_v63, %v5727_v58 }
 0x16a   :  { %v2712_v26 = vadd.f32 %v5746_v9, %v1582_v39  ;;  %v4243_v35 = vcombine.low %v2709_v55, %v2710_v46  ;;  %v4337_v47 = vcombine.low %v6210_v33, %v6202_v60  ;;  %v4242_v51 = vcombine.low %v2707_v11, %v2708_v5 }
 0x16b   :  { %v4930_v4 = vmax.f32 %v4928_v50, %v4929_v2  ;;  %v4224_v30 = vrot.slane %v4196_v17, %v5727_v58  ;;  %v814_v41 = vcombine.high %v806_v56, %v806_v56  ;;  %v815_v27 = vcombine.high %v813_v62, %v813_v62 }
 0x16c   :  { %v4244_v54 = vcombine.low %v2711_v43, %v2712_v26  ;;  %v4259_v59 = vrot.slane %v4243_v35, %v5727_v58  ;;  %v4252_v55 = vrot.slane %v4242_v51, %v5727_v58  ;;  %v822_v36 = vrot.slane %v806_v56, %v5727_v58 }
 0x16d   :  { %v4931_v19 = vrot.slane %v4930_v4, 4  ;;  %v4226_v39 = vcombine.low %v4217_v3, %v4224_v30  ;;  %v829_v46 = vrot.slane %v813_v62, %v5727_v58  ;;  %v836_v60 = vrot.slane %v814_v41, %v5727_v58 }
 0x16e   :  { %v4266_v63 = vrot.slane %v4244_v54, %v5727_v58  ;;  %v6290_v33 = vrot.slane %v815_v27, %v5727_v58  ;;  %v4274_v50 = vcombine.low %v4252_v55, %v4259_v59  ;;  %v844_v5 = vcombine.high %v822_v36, %v822_v36  ;;  %v6310_v59 = vpop.f32.mrb[13].mxu1 }
 0x16f   :  { %v4932_v2 = vmax.f32 %v4930_v4, %v4931_v19  ;;  %v4240_v11 = vrot.slane %v4226_v39, %v5727_v58  ;;  %v7235_v3 = vrot.slane %v6190_v28, 1  ;;  %v845_v26 = vcombine.high %v829_v46, %v829_v46 }
 0x170   :  { %v4275_v17 = vcombine.low %v4266_v63, %v6199_v57  ;;  %v846_v35 = vcombine.high %v836_v60, %v836_v60  ;;  %v4282_v30 = vrot.slane %v4274_v50, %v5727_v58  ;;  %v1681_v4 = vcombine.high %v5853_v37, %v5853_v37 }
 0x171   :  { %v6296_v43 = vmax.f32 %v6190_v28, %v7235_v3  ;;  %v4933_v56 = vrot.slane %v4932_v2, 2  ;;  %v4241_v62 = vcombine.low %v6141_v25, %v4240_v11  ;;  %v6304_v51 = vrot.slane %v4337_v47, %v5727_v58 }
 0x172   :  { %v4289_v54 = vrot.slane %v4275_v17, %v5727_v58  ;;  %v2588_v57 = vadd.f32 %v5737_v6, %v846_v35  ;;  %v2586_v41 = vadd.f32 %v5810_v40, %v836_v60  ;;  %v2587_v25 = vadd.f32 %v5799_v32, %v844_v5 }
 0x173   :  { %7236 = vst [vmem:[#allocation17_spill] sm:$0xff] %v6296_v43  ;;  %v2589_v27 = vadd.f32 %v5743_v8, %v829_v46  ;;  %v2590_v19 = vadd.f32 %v5762_v14, %v6290_v33  ;;  %v6318_v39 = vadd.f32 %v5758_v13, %v822_v36  ;;  %v2591_v55 = vadd.f32 %v5770_v16, %v845_v26 }
 0x174   :  { %v4290_v47 = vcombine.low %v4282_v30, %v4289_v54  ;;  %v1688_v63 = vrot.slane %v5853_v37, %v5727_v58  ;;  %v4934_v11 = vmax.f32 %v4932_v2, %v4933_v56  ;;  %v5025_v50 = vsel %vm4913_vm2, %v4241_v62, -inf }
 0x175   :  { %v3458_v60 = vcombine.low %v2588_v57, %v2589_v27  ;;  %v1695_v5 = vrot.slane %v1681_v4, %v5727_v58  ;;  %v3459_v3 = vcombine.low %v2590_v19, %v2591_v55  ;;  %v750_v35 = vcombine.high %v5858_v38, %v5858_v38 }
 0x176   :  { %v5026_v46 = vsel %vm4913_vm2, %v4290_v47, -inf  ;;  %v1696_v17 = vcombine.high %v1688_v63, %v1688_v63  ;;  %v3412_v30 = vcombine.low %v2586_v41, %v2587_v25  ;;  %v1704_v2 = vrot.slane %v1688_v63, %v5727_v58 }
 0x177   :  { %v5027_v36 = vmax.f32 %v5025_v50, %v5026_v46  ;;  %v3468_v26 = vrot.slane %v3458_v60, %v5727_v58  ;;  %v1697_v54 = vcombine.high %v1695_v5, %v1695_v5  ;;  %v3475_v37 = vrot.slane %v3459_v3, %v5727_v58 }
 0x178   :  { %v1711_v56 = vrot.slane %v1695_v5, %v5727_v58  ;;  %v1718_v62 = vrot.slane %v1696_v17, %v5727_v58  ;;  %v4935_v4 = vrot.slane %v4934_v11, 1  ;;  %v757_v19 = vrot.slane %v5858_v38, %v5727_v58 }
 0x179   :  { %v5029_v57 = vmax.f32 %v5027_v36, %v6213_v31  ;;  %v1725_v27 = vrot.slane %v1697_v54, %v5727_v58  ;;  %v1726_v41 = vcombine.high %v1704_v2, %v1704_v2  ;;  %v764_v55 = vrot.slane %v750_v35, %v5727_v58 }
 0x17a   :  { %v1727_v25 = vcombine.high %v1711_v56, %v1711_v56  ;;  %v1728_v47 = vcombine.high %v1718_v62, %v1718_v62  ;;  %v6339_v63 = vrot.slane %v3412_v30, %v5727_v58  ;;  %v2730_v5 = vadd.f32 %v5766_v15, %v1718_v62  ;;  %v6349_v62 = vpop.f32.mrb[14].mxu0 }
 0x17b   :  { %v5030_v50 = vrot.slane %v5029_v57, 4  ;;  %v1729_v60 = vcombine.high %v1725_v27, %v1725_v27  ;;  %v3490_v46 = vcombine.low %v3468_v26, %v3475_v37  ;;  %v2731_v31 = vadd.f32 %v5774_v18, %v1726_v41 }
 0x17c   :  { %v2732_v3 = vadd.f32 %v5784_v22, %v1728_v47  ;;  %v2733_v17 = vadd.f32 %v5749_v10, %v1711_v56  ;;  %v2734_v36 = vadd.f32 %v5755_v12, %v1725_v27  ;;  %v2735_v54 = vadd.f32 %v5781_v21, %v1727_v25 }
 0x17d   :  { %v5031_v38 = vmax.f32 %v5029_v57, %v5030_v50  ;;  %v2736_v35 = vadd.f32 %v5792_v29, %v1729_v60  ;;  %v4357_v28 = vcombine.low %v2730_v5, %v2731_v31  ;;  %v765_v52 = vcombine.high %v757_v19, %v757_v19 }
 0x17e   :  { %v4409_v30 = vrot.slane %v2732_v3, %v5727_v58  ;;  %v766_v43 = vcombine.high %v764_v55, %v764_v55  ;;  %v4417_v37 = vcombine.low %v2733_v17, %v2734_v36  ;;  %v773_v47 = vrot.slane %v757_v19, %v5727_v58 }
 0x17f   :  { %v5032_v26 = vrot.slane %v5031_v38, 2  ;;  %v4418_v41 = vcombine.low %v2735_v54, %v2736_v35  ;;  %v6352_v56 = vmax.f32 %v4934_v11, %v4935_v4  ;;  %v6355_v57 = vadd.f32 %v5746_v9, %v1704_v2 }
 0x180   :  { %v780_v27 = vrot.slane %v764_v55, %v5727_v58  ;;  %v787_v25 = vrot.slane %v765_v52, %v5727_v58  ;;  %v6360_v50 = vrot.slane %v3490_v46, %v5727_v58  ;;  %v6363_v60 = vrot.slane %v4357_v28, %v5727_v58 }
 0x181   :  { %7237 = vst [vmem:[#allocation18_spill] sm:$0xff] %v6352_v56  ;;  %v4416_v5 = vrot.slane %v4409_v30, %v5727_v58  ;;  %v794_v31 = vrot.slane %v766_v43, %v5727_v58  ;;  %v6367_v19 = vmax.f32 %v5031_v38, %v5032_v26  ;;  %v795_v11 = vcombine.high %v773_v47, %v773_v47 }
 0x182   :  { %v796_v4 = vcombine.high %v780_v27, %v780_v27  ;;  %v797_v2 = vcombine.high %v787_v25, %v787_v25  ;;  %v6370_v3 = vrot.slane %v4417_v37, %v5727_v58  ;;  %v6373_v52 = vrot.slane %v4418_v41, %v5727_v58 }
 0x183   :  { %7238 = vst [vmem:[#allocation19_spill] sm:$0xff] %v6367_v19  ;;  %v798_v55 = vcombine.high %v794_v31, %v794_v31  ;;  %v2577_v46 = vadd.f32 %v5766_v15, %v773_v47  ;;  %v2578_v28 = vadd.f32 %v5774_v18, %v787_v25  ;;  %v2579_v17 = vadd.f32 %v5784_v22, %v795_v11  ;;  %v7253_v19 = vld [vmem:[#allocation13_spill] sm:$0xff] }
 0x184   :  { %v2580_v43 = vadd.f32 %v5749_v10, %v797_v2  ;;  %v2581_v38 = vadd.f32 %v5755_v12, %v780_v27  ;;  %v6381_v36 = vsel %vm4917_vm1, %v4416_v5, -inf  ;;  %v2582_v54 = vadd.f32 %v5781_v21, %v794_v31 }
 0x185   :  { %v2583_v35 = vadd.f32 %v5792_v29, %v796_v4  ;;  %v2584_v30 = vadd.f32 %v5777_v20, %v798_v55  ;;  %v3349_v26 = vcombine.low %v2577_v46, %v2578_v28  ;;  %v7239_v37 = vcombine.low %v6151_v61, %v6156_v48  ;;  %v7241_v4 = vld [vmem:[#allocation8_spill] sm:$0xff]  ;;  %v6398_v55 = vpop.f32.mrb[14].mxu1 }
 0x186   :  { %v3401_v47 = vrot.slane %v2579_v17, %v5727_v58  ;;  %v3409_v25 = vcombine.low %v2580_v43, %v2581_v38  ;;  %v7240_v5 = vcombine.low %v6256_v23, %v6262_v0  ;;  %v1632_v2 = vcombine.high %v7241_v4, %v7241_v4 }
 0x187   :  { %v3370_v41 = vrot.slane %v7239_v37, %v5727_v58  ;;  %v3410_v11 = vcombine.low %v2582_v54, %v2583_v35  ;;  %v3411_v27 = vcombine.low %v2584_v30, %v6318_v39  ;;  %v3377_v46 = vrot.slane %v3349_v26, %v5727_v58 }
 0x188   :  { %v4937_v31 = vsel %vm4913_vm2, %v7240_v5, -inf  ;;  %v3408_v61 = vrot.slane %v3401_v47, %v5727_v58  ;;  %v3419_v48 = vrot.slane %v3409_v25, %v5727_v58  ;;  %v1639_v28 = vrot.slane %v7241_v4, %v5727_v58  ;;  %v6419_v4 = vpop.f32.mrb[15].mxu0 }
 0x189   :  { %v3426_v39 = vrot.slane %v3410_v11, %v5727_v58  ;;  %v3433_v23 = vrot.slane %v3411_v27, %v5727_v58  ;;  %v1646_v0 = vrot.slane %v1632_v2, %v5727_v58  ;;  %v7242_v17 = vcombine.high %v6172_v1, %v6172_v1 }
 0x18a   :  { %v3379_v38 = vcombine.low %v3370_v41, %v3377_v46  ;;  %v4940_v54 = vsel %vm4917_vm1, %v3408_v61, -inf  ;;  %v1647_v35 = vcombine.high %v1639_v28, %v1639_v28  ;;  %v1655_v30 = vrot.slane %v1639_v28, %v5727_v58 }
 0x18b   :  { %v2720_v43 = vadd.f32 %v5777_v20, %v7242_v17  ;;  %v3441_v26 = vcombine.low %v3419_v48, %v3426_v39  ;;  %v3442_v37 = vcombine.low %v3433_v23, %v6339_v63  ;;  %v1648_v47 = vcombine.high %v1646_v0, %v1646_v0 }
 0x18c   :  { %v1662_v25 = vrot.slane %v1646_v0, %v5727_v58  ;;  %v3393_v11 = vrot.slane %v3379_v38, %v5727_v58  ;;  %v1669_v27 = vrot.slane %v1647_v35, %v5727_v58  ;;  %v1677_v5 = vcombine.high %v1655_v30, %v1655_v30 }
 0x18d   :  { %v2721_v1 = vadd.f32 %v5758_v13, %v1655_v30  ;;  %v6422_v41 = vrot.slane %v3441_v26, %v5727_v58  ;;  %v6425_v2 = vrot.slane %v3442_v37, %v5727_v58  ;;  %v1676_v63 = vrot.slane %v1648_v47, %v5727_v58 }
 0x18e   :  { %v1678_v46 = vcombine.high %v1662_v25, %v1662_v25  ;;  %v3394_v61 = vcombine.low %v6193_v53, %v3393_v11  ;;  %v1679_v48 = vcombine.high %v1669_v27, %v1669_v27  ;;  %v2722_v28 = vadd.f32 %v5810_v40, %v1669_v27  ;;  %v7243_v27 = vld [vmem:[#allocation9_spill] sm:$0xff] }
 0x18f   :  { %v2723_v39 = vadd.f32 %v5799_v32, %v1677_v5  ;;  %v1680_v0 = vcombine.high %v1676_v63, %v1676_v63  ;;  %v2725_v17 = vadd.f32 %v5743_v8, %v1662_v25  ;;  %v2726_v38 = vadd.f32 %v5762_v14, %v1676_v63 }
 0x190   :  { %v4938_v35 = vsel %vm4913_vm2, %v3394_v61, -inf  ;;  %v2724_v30 = vadd.f32 %v5737_v6, %v1679_v48  ;;  %v2727_v26 = vadd.f32 %v5770_v16, %v1678_v46  ;;  %v4307_v53 = vcombine.low %v2720_v43, %v2721_v1 }
 0x191   :  { %v4939_v37 = vmax.f32 %v4937_v31, %v4938_v35  ;;  %v2728_v47 = vadd.f32 %v5740_v7, %v1680_v0  ;;  %v4308_v11 = vcombine.low %v2722_v28, %v2723_v39  ;;  %v897_v5 = vcombine.high %v7243_v27, %v7243_v27 }
 0x192   :  { %v4329_v23 = vrot.slane %v4307_v53, %v5727_v58  ;;  %v4354_v56 = vcombine.low %v2724_v30, %v2725_v17  ;;  %v4355_v25 = vcombine.low %v2726_v38, %v2727_v26  ;;  %v904_v63 = vrot.slane %v7243_v27, %v5727_v58  ;;  %v6453_v53 = vpop.f32.mrb[15].mxu1 }
 0x193   :  { %v4941_v61 = vmax.f32 %v4939_v37, %v4940_v54  ;;  %v4336_v48 = vrot.slane %v4308_v11, %v5727_v58  ;;  %v4356_v46 = vcombine.low %v2728_v47, %v6355_v57  ;;  %v911_v31 = vrot.slane %v897_v5, %v5727_v58  ;;  %7244 = vst [vmem:[#allocation8_spill] sm:$0xff] %v6453_v53 }
 0x194   :  { %v4364_v43 = vrot.slane %v4354_v56, %v5727_v58  ;;  %v4371_v1 = vrot.slane %v4355_v25, %v5727_v58  ;;  %v912_v28 = vcombine.high %v904_v63, %v904_v63  ;;  %v920_v39 = vrot.slane %v904_v63, %v5727_v58 }
 0x195   :  { %v4942_v0 = vrot.slane %v4941_v61, 4  ;;  %v4338_v17 = vcombine.low %v4329_v23, %v4336_v48  ;;  %v4378_v38 = vrot.slane %v4356_v46, %v5727_v58  ;;  %v913_v35 = vcombine.high %v911_v31, %v911_v31 }
 0x196   :  { %v4386_v30 = vcombine.low %v4364_v43, %v4371_v1  ;;  %v927_v54 = vrot.slane %v911_v31, %v5727_v58  ;;  %v934_v26 = vrot.slane %v912_v28, %v5727_v58  ;;  %v942_v57 = vcombine.high %v920_v39, %v920_v39 }
 0x197   :  { %v4943_v37 = vmax.f32 %v4941_v61, %v4942_v0  ;;  %v4352_v56 = vrot.slane %v4338_v17, %v5727_v58  ;;  %v4387_v47 = vcombine.low %v4378_v38, %v6363_v60  ;;  %v941_v11 = vrot.slane %v913_v35, %v5727_v58 }
 0x198   :  { %v4449_v23 = vcombine.low %v6370_v3, %v6373_v52  ;;  %v4394_v27 = vrot.slane %v4386_v30, %v5727_v58  ;;  %v943_v5 = vcombine.high %v927_v54, %v927_v54  ;;  %v944_v25 = vcombine.high %v934_v26, %v934_v26 }
 0x199   :  { %v4944_v63 = vrot.slane %v4943_v37, 2  ;;  %v4353_v48 = vcombine.low %v6304_v51, %v4352_v56  ;;  %v4401_v46 = vrot.slane %v4387_v47, %v5727_v58  ;;  %v945_v31 = vcombine.high %v941_v11, %v941_v11 }
 0x19a   :  { %v2601_v61 = vadd.f32 %v5777_v20, %v920_v39  ;;  %v2602_v43 = vadd.f32 %v5758_v13, %v934_v26  ;;  %v2603_v60 = vadd.f32 %v5810_v40, %v942_v57  ;;  %v2604_v1 = vadd.f32 %v5799_v32, %v944_v25  ;;  %v7245_v57 = vld [vmem:[#allocation11_spill] sm:$0xff] }
 0x19b   :  { %v4945_v28 = vmax.f32 %v4943_v37, %v4944_v63  ;;  %v4402_v3 = vcombine.low %v4394_v27, %v4401_v46  ;;  %v2605_v52 = vadd.f32 %v5737_v6, %v927_v54  ;;  %v2606_v0 = vadd.f32 %v5743_v8, %v941_v11 }
 0x19c   :  { %v2607_v17 = vadd.f32 %v5762_v14, %v943_v5  ;;  %v2608_v51 = vadd.f32 %v5770_v16, %v945_v31  ;;  %v3523_v38 = vcombine.low %v2601_v61, %v2602_v43  ;;  %v3524_v35 = vcombine.low %v2603_v60, %v2604_v1 }
 0x19d   :  { %v5036_v39 = vsel %vm4913_vm2, %v4353_v48, -inf  ;;  %v5037_v30 = vsel %vm4913_vm2, %v4402_v3, -inf  ;;  %v3570_v26 = vcombine.low %v2605_v52, %v2606_v0  ;;  %v1779_v56 = vcombine.high %v7245_v57, %v7245_v57 }
 0x19e   :  { %v5038_v47 = vmax.f32 %v5036_v39, %v5037_v30  ;;  %v3552_v54 = vrot.slane %v3524_v35, %v5727_v58  ;;  %v3571_v11 = vcombine.low %v2607_v17, %v2608_v51  ;;  %v6478_v27 = vrot.slane %v4449_v23, %v5727_v58  ;;  %v7246_v17 = vld [vmem:[#allocation12_spill] sm:$0xff]  ;;  %v6491_v35 = vpop.f32.mrb[16].mxu0 }
 0x19f   :  { %v4946_v5 = vrot.slane %v4945_v28, 1  ;;  %v1786_v25 = vrot.slane %v7245_v57, %v5727_v58  ;;  %v1793_v63 = vrot.slane %v1779_v56, %v5727_v58  ;;  %v3545_v46 = vrot.slane %v3523_v38, %v5727_v58  ;;  %7247 = vst [vmem:[#allocation9_spill] sm:$0xff] %v6491_v35 }
 0x1a0   :  { %v5040_v48 = vmax.f32 %v5038_v47, %v6381_v36  ;;  %v3580_v31 = vrot.slane %v3570_v26, %v5727_v58  ;;  %v3587_v61 = vrot.slane %v3571_v11, %v5727_v58  ;;  %v848_v51 = vcombine.high %v7246_v17, %v7246_v17 }
 0x1a1   :  { %v1794_v43 = vcombine.high %v1786_v25, %v1786_v25  ;;  %v1795_v60 = vcombine.high %v1793_v63, %v1793_v63  ;;  %v1802_v1 = vrot.slane %v1786_v25, %v5727_v58  ;;  %v1809_v23 = vrot.slane %v1793_v63, %v5727_v58 }
 0x1a2   :  { %v5041_v3 = vrot.slane %v5040_v48, 4  ;;  %v3554_v52 = vcombine.low %v3545_v46, %v3552_v54  ;;  %v3602_v0 = vcombine.low %v3580_v31, %v3587_v61  ;;  %v855_v30 = vrot.slane %v7246_v17, %v5727_v58 }
 0x1a3   :  { %v1816_v36 = vrot.slane %v1794_v43, %v5727_v58  ;;  %v6495_v38 = vrot.slane %v1795_v60, %v5727_v58  ;;  %v1824_v39 = vcombine.high %v1802_v1, %v1802_v1  ;;  %v1825_v57 = vcombine.high %v1809_v23, %v1809_v23 }
 0x1a4   :  { %v5042_v26 = vmax.f32 %v5040_v48, %v5041_v3  ;;  %v2745_v56 = vadd.f32 %v5740_v7, %v1802_v1  ;;  %v2749_v47 = vadd.f32 %v5784_v22, %v1809_v23  ;;  %v6501_v54 = vmax.f32 %v4945_v28, %v4946_v5 }
 0x1a5   :  { %v1826_v11 = vcombine.high %v1816_v36, %v1816_v36  ;;  %v2746_v25 = vadd.f32 %v5746_v9, %v1816_v36  ;;  %v2747_v63 = vadd.f32 %v5766_v15, %v1824_v39  ;;  %v6506_v31 = vrot.slane %v3554_v52, %v5727_v58 }
 0x1a6   :  { %7248 = vst [vmem:[#allocation11_spill] sm:$0xff] %v6501_v54  ;;  %v5043_v46 = vrot.slane %v5042_v26, 2  ;;  %v6509_v61 = vrot.slane %v3602_v0, %v5727_v58  ;;  %v862_v28 = vrot.slane %v848_v51, %v5727_v58  ;;  %v863_v5 = vcombine.high %v855_v30, %v855_v30 }
 0x1a7   :  { %v2748_v43 = vadd.f32 %v5774_v18, %v1826_v11  ;;  %v4468_v60 = vcombine.low %v2745_v56, %v2746_v25  ;;  %v6517_v1 = vadd.f32 %v5749_v10, %v6495_v38  ;;  %v6520_v23 = vadd.f32 %v5755_v12, %v1825_v57 }
 0x1a8   :  { %v4521_v3 = vrot.slane %v2749_v47, %v5727_v58  ;;  %v871_v52 = vrot.slane %v855_v30, %v5727_v58  ;;  %v864_v36 = vcombine.high %v862_v28, %v862_v28  ;;  %v878_v39 = vrot.slane %v862_v28, %v5727_v58 }
 0x1a9   :  { %v4469_v0 = vcombine.low %v2747_v63, %v2748_v43  ;;  %v6525_v17 = vrot.slane %v4468_v60, %v5727_v58  ;;  %v6528_v51 = vmax.f32 %v5042_v26, %v5043_v46  ;;  %v885_v56 = vrot.slane %v863_v5, %v5727_v58 }
 0x1aa   :  { %v893_v11 = vcombine.high %v871_v52, %v871_v52  ;;  %v7250_v57 = vcombine.high %v6290_v33, %v6290_v33  ;;  %v892_v30 = vrot.slane %v864_v36, %v5727_v58  ;;  %v894_v63 = vcombine.high %v878_v39, %v878_v39  ;;  %v6549_v36 = vpop.f32.mrb[17].mxu0 }
 0x1ab   :  { %7249 = vst [vmem:[#allocation12_spill] sm:$0xff] %v6528_v51  ;;  %v6536_v47 = vrot.slane %v4469_v0, %v5727_v58  ;;  %v2593_v43 = vadd.f32 %v5746_v9, %v871_v52  ;;  %v6541_v60 = vrot.slane %v4521_v3, %v5727_v58  ;;  %v895_v26 = vcombine.high %v885_v56, %v885_v56 }
 0x1ac   :  { %v2592_v25 = vadd.f32 %v5740_v7, %v7250_v57  ;;  %v2594_v46 = vadd.f32 %v5766_v15, %v885_v56  ;;  %v2595_v28 = vadd.f32 %v5774_v18, %v893_v11  ;;  %v896_v5 = vcombine.high %v892_v30, %v892_v30  ;;  %7251 = vst [vmem:[#allocation20_spill] sm:$0xff] %v6549_v36 }
 0x1ad   :  { %v2597_v0 = vadd.f32 %v5749_v10, %v878_v39  ;;  %v2598_v57 = vadd.f32 %v5755_v12, %v892_v30  ;;  %v2596_v52 = vadd.f32 %v5784_v22, %v895_v26  ;;  %v2599_v3 = vadd.f32 %v5781_v21, %v894_v63 }
 0x1ae   :  { %v3460_v37 = vcombine.low %v2592_v25, %v2593_v43  ;;  %v3461_v48 = vcombine.low %v2594_v46, %v2595_v28  ;;  %v2600_v56 = vadd.f32 %v5792_v29, %v896_v5  ;;  %v7252_v11 = vcombine.low %v6422_v41, %v6425_v2  ;;  %v7254_v41 = vld [vmem:[#allocation15_spill] sm:$0xff] }
 0x1af   :  { %v3521_v54 = vcombine.low %v2597_v0, %v2598_v57  ;;  %v1730_v39 = vcombine.high %v7253_v19, %v7253_v19  ;;  %v3513_v26 = vrot.slane %v2596_v52, %v5727_v58  ;;  %v1737_v25 = vrot.slane %v7253_v19, %v5727_v58 }
 0x1b0   :  { %v4948_v33 = vsel %vm4913_vm2, %v7252_v11, -inf  ;;  %v3482_v30 = vrot.slane %v3460_v37, %v5727_v58  ;;  %v3489_v51 = vrot.slane %v3461_v48, %v5727_v58  ;;  %v3522_v63 = vcombine.low %v2599_v3, %v2600_v56 }
 0x1b1   :  { %v3531_v43 = vrot.slane %v3521_v54, %v5727_v58  ;;  %v1744_v46 = vrot.slane %v1730_v39, %v5727_v58  ;;  %v995_v2 = vcombine.high %v7254_v41, %v7254_v41  ;;  %v3520_v5 = vrot.slane %v3513_v26, %v5727_v58 }
 0x1b2   :  { %v3491_v28 = vcombine.low %v3482_v30, %v3489_v51  ;;  %v1745_v0 = vcombine.high %v1737_v25, %v1737_v25  ;;  %v1753_v37 = vrot.slane %v1737_v25, %v5727_v58  ;;  %v3538_v48 = vrot.slane %v3522_v63, %v5727_v58 }
 0x1b3   :  { %v1746_v57 = vcombine.high %v1744_v46, %v1744_v46  ;;  %v1760_v52 = vrot.slane %v1744_v46, %v5727_v58  ;;  %v1002_v19 = vrot.slane %v7254_v41, %v5727_v58  ;;  %v4951_v3 = vsel %vm4917_vm1, %v3520_v5, -inf }
 0x1b4   :  { %v3505_v54 = vrot.slane %v3491_v28, %v5727_v58  ;;  %v1767_v56 = vrot.slane %v1745_v0, %v5727_v58  ;;  %v1775_v51 = vcombine.high %v1753_v37, %v1753_v37  ;;  %v3553_v11 = vcombine.low %v3531_v43, %v3538_v48 }
 0x1b5   :  { %v1774_v39 = vrot.slane %v1746_v57, %v5727_v58  ;;  %v1776_v30 = vcombine.high %v1760_v52, %v1760_v52  ;;  %v2737_v26 = vadd.f32 %v5777_v20, %v1753_v37  ;;  %v2741_v0 = vadd.f32 %v5737_v6, %v1760_v52 }
 0x1b6   :  { %v3506_v25 = vcombine.low %v6360_v50, %v3505_v54  ;;  %v1777_v63 = vcombine.high %v1767_v56, %v1767_v56  ;;  %v2738_v46 = vadd.f32 %v5758_v13, %v1767_v56  ;;  %v2739_v41 = vadd.f32 %v5810_v40, %v1775_v51 }
 0x1b7   :  { %v6584_v28 = vrot.slane %v3553_v11, %v5727_v58  ;;  %v1778_v5 = vcombine.high %v1774_v39, %v1774_v39  ;;  %v2742_v43 = vadd.f32 %v5743_v8, %v1774_v39  ;;  %v2743_v37 = vadd.f32 %v5762_v14, %v1776_v30 }
 0x1b8   :  { %v4949_v48 = vsel %vm4913_vm2, %v3506_v25, -inf  ;;  %v2740_v57 = vadd.f32 %v5799_v32, %v1777_v63  ;;  %v4419_v50 = vcombine.low %v2737_v26, %v2738_v46  ;;  %v1009_v52 = vrot.slane %v995_v2, %v5727_v58 }
 0x1b9   :  { %v3569_v54 = vcombine.low %v6584_v28, %v6506_v31  ;;  %v4950_v56 = vmax.f32 %v4948_v33, %v4949_v48  ;;  %v2744_v51 = vadd.f32 %v5770_v16, %v1778_v5  ;;  %v4466_v11 = vcombine.low %v2741_v0, %v2742_v43 }
 0x1ba   :  { %v4420_v36 = vcombine.low %v2739_v41, %v2740_v57  ;;  %v4441_v35 = vrot.slane %v4419_v50, %v5727_v58  ;;  %v1010_v39 = vcombine.high %v1002_v19, %v1002_v19  ;;  %v1018_v30 = vrot.slane %v1002_v19, %v5727_v58 }
 0x1bb   :  { %v4952_v53 = vmax.f32 %v4950_v56, %v4951_v3  ;;  %v4467_v25 = vcombine.low %v2743_v37, %v2744_v51  ;;  %v4476_v63 = vrot.slane %v4466_v11, %v5727_v58  ;;  %v1011_v46 = vcombine.high %v1009_v52, %v1009_v52 }
 0x1bc   :  { %v4448_v26 = vrot.slane %v4420_v36, %v5727_v58  ;;  %v1025_v33 = vrot.slane %v1009_v52, %v5727_v58  ;;  %v1032_v5 = vrot.slane %v1010_v39, %v5727_v58  ;;  %v1040_v43 = vcombine.high %v1018_v30, %v1018_v30 }
 0x1bd   :  { %v4953_v0 = vrot.slane %v4952_v53, 4  ;;  %v4483_v2 = vrot.slane %v4467_v25, %v5727_v58  ;;  %v7255_v3 = vcombine.low %v6525_v17, %v6536_v47  ;;  %v6609_v36 = vrot.slane %v1011_v46, %v5727_v58 }
 0x1be   :  { %v4450_v19 = vcombine.low %v4441_v35, %v4448_v26  ;;  %v1042_v57 = vcombine.high %v1032_v5, %v1032_v5  ;;  %v2618_v56 = vadd.f32 %v5777_v20, %v1032_v5  ;;  %v2619_v51 = vadd.f32 %v5758_v13, %v1040_v43 }
 0x1bf   :  { %v4513_v48 = vrot.slane %v7255_v3, %v5727_v58  ;;  %v4954_v37 = vmax.f32 %v4952_v53, %v4953_v0  ;;  %v4498_v50 = vcombine.low %v4476_v63, %v4483_v2  ;;  %v1041_v52 = vcombine.high %v1025_v33, %v1025_v33 }
 0x1c0   :  { %v4464_v11 = vrot.slane %v4450_v19, %v5727_v58  ;;  %v2620_v39 = vadd.f32 %v5810_v40, %v1042_v57  ;;  %v2621_v25 = vadd.f32 %v5799_v32, %v1025_v33  ;;  %v5050_v35 = vsel %vm4917_vm1, %v6541_v60, -inf }
 0x1c1   :  { %v4955_v17 = vrot.slane %v4954_v37, 2  ;;  %v4506_v47 = vrot.slane %v4498_v50, %v5727_v58  ;;  %v6620_v53 = vadd.f32 %v5792_v29, %v1018_v30  ;;  %v3635_v26 = vcombine.low %v2618_v56, %v2619_v51 }
 0x1c2   :  { %v4465_v63 = vcombine.low %v6478_v27, %v4464_v11  ;;  %v3636_v46 = vcombine.low %v2620_v39, %v2621_v25  ;;  %v1877_v5 = vcombine.high %v6071_v42, %v6071_v42  ;;  %v6629_v60 = vadd.f32 %v5737_v6, %v6609_v36 }
 0x1c3   :  { %v4514_v0 = vcombine.low %v4506_v47, %v4513_v48  ;;  %v1884_v2 = vrot.slane %v6071_v42, %v5727_v58  ;;  %v6633_v30 = vmax.f32 %v4954_v37, %v4955_v17  ;;  %v6636_v27 = vadd.f32 %v5743_v8, %v1041_v52 }
 0x1c4   :  { %v3664_v43 = vrot.slane %v3636_v46, %v5727_v58  ;;  %v1891_v3 = vrot.slane %v1877_v5, %v5727_v58  ;;  %v5047_v48 = vsel %vm4913_vm2, %v4465_v63, -inf  ;;  %v3657_v51 = vrot.slane %v3635_v26, %v5727_v58 }
 0x1c5   :  { %v5048_v19 = vsel %vm4913_vm2, %v4514_v0, -inf  ;;  %v1892_v57 = vcombine.high %v1884_v2, %v1884_v2  ;;  %v1900_v50 = vrot.slane %v1884_v2, %v5727_v58  ;;  %v946_v39 = vcombine.high %v6100_v34, %v6100_v34 }
 0x1c6   :  { %v5049_v56 = vmax.f32 %v5047_v48, %v5048_v19  ;;  %v1893_v42 = vcombine.high %v1891_v3, %v1891_v3  ;;  %v1907_v37 = vrot.slane %v1891_v3, %v5727_v58  ;;  %v953_v25 = vrot.slane %v6100_v34, %v5727_v58 }
 0x1c7   :  { %v1914_v11 = vrot.slane %v1892_v57, %v5727_v58  ;;  %v1922_v52 = vcombine.high %v1900_v50, %v1900_v50  ;;  %v3666_v47 = vcombine.low %v3657_v51, %v3664_v43  ;;  %v960_v43 = vrot.slane %v946_v39, %v5727_v58 }
 0x1c8   :  { %v5051_v17 = vmax.f32 %v5049_v56, %v5050_v35  ;;  %v1921_v46 = vrot.slane %v1893_v42, %v5727_v58  ;;  %v2765_v2 = vadd.f32 %v5774_v18, %v1907_v37  ;;  %v1923_v48 = vcombine.high %v1907_v37, %v1907_v37 }
 0x1c9   :  { %v1924_v26 = vcombine.high %v1914_v11, %v1914_v11  ;;  %v2762_v5 = vadd.f32 %v5740_v7, %v1914_v11  ;;  %v2763_v0 = vadd.f32 %v5746_v9, %v1922_v52  ;;  %v961_v56 = vcombine.high %v953_v25, %v953_v25 }
 0x1ca   :  { %v5052_v3 = vrot.slane %v5051_v17, 4  ;;  %v1925_v19 = vcombine.high %v1921_v46, %v1921_v46  ;;  %v2766_v57 = vadd.f32 %v5784_v22, %v1921_v46  ;;  %v6662_v42 = vrot.slane %v3666_v47, %v5727_v58 }
 0x1cb   :  { %v2764_v34 = vadd.f32 %v5766_v15, %v1924_v26  ;;  %v4580_v35 = vcombine.low %v2762_v5, %v2763_v0  ;;  %v6665_v11 = vadd.f32 %v5770_v16, %v1900_v50  ;;  %v969_v52 = vrot.slane %v953_v25, %v5727_v58 }
 0x1cc   :  { %v6659_v51 = vmax.f32 %v5051_v17, %v5052_v3  ;;  %v4633_v63 = vrot.slane %v2766_v57, %v5727_v58  ;;  %v962_v46 = vcombine.high %v960_v43, %v960_v43  ;;  %v976_v26 = vrot.slane %v960_v43, %v5727_v58 }
 0x1cd   :  { %v4581_v37 = vcombine.low %v2764_v34, %v2765_v2  ;;  %v6671_v5 = vadd.f32 %v5749_v10, %v1923_v48  ;;  %v6674_v39 = vadd.f32 %v5755_v12, %v1925_v19  ;;  %v6677_v17 = vrot.slane %v4580_v35, %v5727_v58 }
 0x1ce   :  { %v983_v50 = vrot.slane %v961_v56, %v5727_v58  ;;  %v990_v25 = vrot.slane %v962_v46, %v5727_v58  ;;  %v991_v0 = vcombine.high %v969_v52, %v969_v52  ;;  %v992_v2 = vcombine.high %v976_v26, %v976_v26 }
 0x1cf   :  { %v6681_v47 = vrot.slane %v4581_v37, %v5727_v58  ;;  %v2609_v48 = vadd.f32 %v5740_v7, %v969_v52  ;;  %v6688_v34 = vrot.slane %v4633_v63, %v5727_v58  ;;  %v2613_v56 = vadd.f32 %v5784_v22, %v976_v26 }
 0x1d0   :  { %v993_v57 = vcombine.high %v983_v50, %v983_v50  ;;  %v2610_v19 = vadd.f32 %v5746_v9, %v983_v50  ;;  %v994_v35 = vcombine.high %v990_v25, %v990_v25  ;;  %v2611_v43 = vadd.f32 %v5766_v15, %v991_v0 }
 0x1d1   :  { %v2614_v46 = vadd.f32 %v5749_v10, %v990_v25  ;;  %v2615_v33 = vadd.f32 %v5755_v12, %v992_v2  ;;  %v3625_v63 = vrot.slane %v2613_v56, %v5727_v58  ;;  %v4959_v0 = vsel %vm4913_vm2, %v3569_v54, -inf }
 0x1d2   :  { %v2612_v37 = vadd.f32 %v5774_v18, %v993_v57  ;;  %v3572_v3 = vcombine.low %v2609_v48, %v2610_v19  ;;  %v2616_v50 = vadd.f32 %v5781_v21, %v994_v35  ;;  %v1828_v25 = vcombine.high %v6138_v24, %v6138_v24 }
 0x1d3   :  { %v3633_v41 = vcombine.low %v2614_v46, %v2615_v33  ;;  %v3632_v2 = vrot.slane %v3625_v63, %v5727_v58  ;;  %v1835_v19 = vrot.slane %v6138_v24, %v5727_v58  ;;  %v7256_v35 = vcombine.high %v6495_v38, %v6495_v38 }
 0x1d4   :  { %v3573_v26 = vcombine.low %v2611_v43, %v2612_v37  ;;  %v3594_v57 = vrot.slane %v3572_v3, %v5727_v58  ;;  %v3634_v48 = vcombine.low %v2616_v50, %v6620_v53  ;;  %v1842_v33 = vrot.slane %v1828_v25, %v5727_v58 }
 0x1d5   :  { %v2752_v31 = vadd.f32 %v5781_v21, %v7256_v35  ;;  %v3643_v54 = vrot.slane %v3633_v41, %v5727_v58  ;;  %v7257_v3 = vcombine.low %v6517_v1, %v6520_v23  ;;  %v4962_v24 = vsel %vm4917_vm1, %v3632_v2, -inf }
 0x1d6   :  { %v3601_v28 = vrot.slane %v3573_v26, %v5727_v58  ;;  %v3650_v53 = vrot.slane %v3634_v48, %v5727_v58  ;;  %v1843_v56 = vcombine.high %v1835_v19, %v1835_v19  ;;  %v1851_v38 = vrot.slane %v1835_v19, %v5727_v58 }
 0x1d7   :  { %v4539_v43 = vrot.slane %v7257_v3, %v5727_v58  ;;  %v1844_v46 = vcombine.high %v1842_v33, %v1842_v33  ;;  %v1858_v50 = vrot.slane %v1842_v33, %v5727_v58  ;;  %v1093_v41 = vcombine.high %v6182_v44, %v6182_v44 }
 0x1d8   :  { %v3603_v37 = vcombine.low %v3594_v57, %v3601_v28  ;;  %v3665_v63 = vcombine.low %v3643_v54, %v3650_v53  ;;  %v1865_v26 = vrot.slane %v1843_v56, %v5727_v58  ;;  %v1873_v25 = vcombine.high %v1851_v38, %v1851_v38 }
 0x1d9   :  { %v2753_v1 = vadd.f32 %v5792_v29, %v1851_v38  ;;  %v1872_v2 = vrot.slane %v1844_v46, %v5727_v58  ;;  %v1874_v48 = vcombine.high %v1858_v50, %v1858_v50  ;;  %v2757_v19 = vadd.f32 %v5799_v32, %v1858_v50 }
 0x1da   :  { %v3617_v23 = vrot.slane %v3603_v37, %v5727_v58  ;;  %v6733_v57 = vrot.slane %v3665_v63, %v5727_v58  ;;  %v1875_v35 = vcombine.high %v1865_v26, %v1865_v26  ;;  %v2754_v28 = vadd.f32 %v5777_v20, %v1865_v26 }
 0x1db   :  { %v2755_v54 = vadd.f32 %v5758_v13, %v1873_v25  ;;  %v1876_v3 = vcombine.high %v1872_v2, %v1872_v2  ;;  %v2758_v53 = vadd.f32 %v5737_v6, %v1872_v2  ;;  %v2759_v56 = vadd.f32 %v5743_v8, %v1874_v48 }
 0x1dc   :  { %v3618_v33 = vcombine.low %v6509_v61, %v3617_v23  ;;  %v2756_v37 = vadd.f32 %v5810_v40, %v1875_v35  ;;  %v4530_v46 = vcombine.low %v2752_v31, %v2753_v1  ;;  %v1100_v61 = vrot.slane %v6182_v44, %v5727_v58 }
 0x1dd   :  { %v4531_v50 = vcombine.low %v2754_v28, %v2755_v54  ;;  %v2760_v26 = vadd.f32 %v5762_v14, %v1876_v3  ;;  %v4578_v52 = vcombine.low %v2758_v53, %v2759_v56  ;;  %v1107_v31 = vrot.slane %v1093_v41, %v5727_v58 }
 0x1de   :  { %v4960_v63 = vsel %vm4913_vm2, %v3618_v33, -inf  ;;  %v4532_v23 = vcombine.low %v2756_v37, %v2757_v19  ;;  %v4546_v2 = vrot.slane %v4530_v46, %v5727_v58  ;;  %v1108_v1 = vcombine.high %v1100_v61, %v1100_v61 }
 0x1df   :  { %v4961_v25 = vmax.f32 %v4959_v0, %v4960_v63  ;;  %v4553_v48 = vrot.slane %v4531_v50, %v5727_v58  ;;  %v4579_v38 = vcombine.low %v2760_v26, %v6665_v11  ;;  %v4588_v35 = vrot.slane %v4578_v52, %v5727_v58 }
 0x1e0   :  { %v4560_v54 = vrot.slane %v4532_v23, %v5727_v58  ;;  %v4561_v33 = vcombine.low %v4539_v43, %v4546_v2  ;;  %v1116_v3 = vrot.slane %v1100_v61, %v5727_v58  ;;  %v1109_v0 = vcombine.high %v1107_v31, %v1107_v31 }
 0x1e1   :  { %v4963_v28 = vmax.f32 %v4961_v25, %v4962_v24  ;;  %v4595_v44 = vrot.slane %v4579_v38, %v5727_v58  ;;  %v1123_v19 = vrot.slane %v1107_v31, %v5727_v58  ;;  %v1130_v53 = vrot.slane %v1108_v1, %v5727_v58 }
 0x1e2   :  { %v4562_v11 = vcombine.low %v4553_v48, %v4560_v54  ;;  %v4569_v52 = vrot.slane %v4561_v33, %v5727_v58  ;;  %v1138_v37 = vcombine.high %v1116_v3, %v1116_v3  ;;  %v7258_v24 = vcombine.low %v6677_v17, %v6681_v47 }
 0x1e3   :  { %v4964_v56 = vrot.slane %v4963_v28, 4  ;;  %v4610_v43 = vcombine.low %v4588_v35, %v4595_v44  ;;  %v1137_v46 = vrot.slane %v1109_v0, %v5727_v58  ;;  %v1140_v50 = vcombine.high %v1130_v53, %v1130_v53 }
 0x1e4   :  { %v4625_v41 = vrot.slane %v7258_v24, %v5727_v58  ;;  %v4576_v63 = vrot.slane %v4562_v11, %v5727_v58  ;;  %v1139_v26 = vcombine.high %v1123_v19, %v1123_v19  ;;  %v2634_v61 = vadd.f32 %v5792_v29, %v1130_v53 }
 0x1e5   :  { %v4965_v38 = vmax.f32 %v4963_v28, %v4964_v56  ;;  %v4618_v25 = vrot.slane %v4610_v43, %v5727_v58  ;;  %v1141_v23 = vcombine.high %v1137_v46, %v1137_v46  ;;  %v2633_v2 = vadd.f32 %v5781_v21, %v1116_v3 }
 0x1e6   :  { %v2636_v48 = vadd.f32 %v5758_v13, %v1140_v50  ;;  %v4577_v31 = vcombine.low %v4569_v52, %v4576_v63  ;;  %v2635_v17 = vadd.f32 %v5777_v20, %v1138_v37  ;;  %v2637_v47 = vadd.f32 %v5810_v40, %v1123_v19 }
 0x1e7   :  { %v2638_v35 = vadd.f32 %v5799_v32, %v1137_v46  ;;  %v4641_v1 = vcombine.low %v6671_v5, %v6674_v39  ;;  %v5061_v28 = vsel %vm4917_vm1, %v6688_v34, -inf  ;;  %v4966_v54 = vrot.slane %v4965_v38, 2 }
 0x1e8   :  { %v4626_v33 = vcombine.low %v4618_v25, %v4625_v41  ;;  %v5058_v44 = vsel %vm4913_vm2, %v4577_v31, -inf  ;;  %v3746_v3 = vcombine.low %v2633_v2, %v2634_v61  ;;  %v3747_v0 = vcombine.low %v2635_v17, %v2636_v48 }
 0x1e9   :  { %v3748_v53 = vcombine.low %v2637_v47, %v2638_v35  ;;  %v6778_v11 = vadd.f32 %v5737_v6, %v1139_v26  ;;  %v6781_v19 = vadd.f32 %v5743_v8, %v1141_v23  ;;  %v1975_v52 = vcombine.high %v6237_v45, %v6237_v45 }
 0x1ea   :  { %v5059_v56 = vsel %vm4913_vm2, %v4626_v33, -inf  ;;  %v3769_v34 = vrot.slane %v3747_v0, %v5727_v58  ;;  %v1982_v41 = vrot.slane %v6237_v45, %v5727_v58  ;;  %v6789_v43 = vmax.f32 %v4965_v38, %v4966_v54 }
 0x1eb   :  { %v5060_v37 = vmax.f32 %v5058_v44, %v5059_v56  ;;  %v3776_v24 = vrot.slane %v3748_v53, %v5727_v58  ;;  %v1989_v46 = vrot.slane %v1975_v52, %v5727_v58  ;;  %v1044_v50 = vcombine.high %v6272_v49, %v6272_v49 }
 0x1ec   :  { %v1051_v63 = vrot.slane %v6272_v49, %v5727_v58  ;;  %v6799_v61 = vrot.slane %v3746_v3, %v5727_v58  ;;  %v1990_v25 = vcombine.high %v1982_v41, %v1982_v41  ;;  %v1998_v23 = vrot.slane %v1982_v41, %v5727_v58 }
 0x1ed   :  { %v6796_v26 = vmax.f32 %v5060_v37, %v5061_v28  ;;  %v3794_v45 = vcombine.low %v6778_v11, %v6781_v19  ;;  %v1991_v38 = vcombine.high %v1989_v46, %v1989_v46  ;;  %v2005_v2 = vrot.slane %v1989_v46, %v5727_v58 }
 0x1ee   :  { %v1058_v48 = vrot.slane %v1044_v50, %v5727_v58  ;;  %v3778_v31 = vcombine.low %v3769_v34, %v3776_v24  ;;  %v2012_v17 = vrot.slane %v1990_v25, %v5727_v58  ;;  %v2020_v49 = vcombine.high %v1998_v23, %v1998_v23 }
 0x1ef   :  { %v1059_v47 = vcombine.high %v1051_v63, %v1051_v63  ;;  %v6808_v35 = vrot.slane %v1991_v38, %v5727_v58  ;;  %v2021_v28 = vcombine.high %v2005_v2, %v2005_v2  ;;  %v2777_v54 = vadd.f32 %v5762_v14, %v1998_v23 }
 0x1f0   :  { %v2781_v33 = vadd.f32 %v5766_v15, %v2005_v2  ;;  %v2022_v44 = vcombine.high %v2012_v17, %v2012_v17  ;;  %v2778_v3 = vadd.f32 %v5770_v16, %v2012_v17  ;;  %v2779_v0 = vadd.f32 %v5740_v7, %v2020_v49 }
 0x1f1   :  { %v7259_v53 = vcombine.high %v6609_v36, %v6609_v36  ;;  %v2782_v37 = vadd.f32 %v5774_v18, %v6808_v35  ;;  %v2783_v34 = vadd.f32 %v5784_v22, %v2021_v28  ;;  %v1060_v24 = vcombine.high %v1058_v48, %v1058_v48 }
 0x1f2   :  { %v6823_v41 = vrot.slane %v3778_v31, %v5727_v58  ;;  %v2780_v46 = vadd.f32 %v5746_v9, %v2022_v44  ;;  %v1067_v50 = vrot.slane %v1051_v63, %v5727_v58  ;;  %v1074_v25 = vrot.slane %v1058_v48, %v5727_v58 }
 0x1f3   :  { %v2624_v56 = vadd.f32 %v5762_v14, %v7259_v53  ;;  %v4691_v36 = vcombine.low %v2777_v54, %v2778_v3  ;;  %v4693_v23 = vcombine.low %v2781_v33, %v2782_v37  ;;  %v1081_v38 = vrot.slane %v1059_v47, %v5727_v58 }
 0x1f4   :  { %v1088_v2 = vrot.slane %v1060_v24, %v5727_v58  ;;  %v4692_v17 = vcombine.low %v2779_v0, %v2780_v46  ;;  %v4745_v49 = vrot.slane %v2783_v34, %v5727_v58  ;;  %v1089_v28 = vcombine.high %v1067_v50, %v1067_v50 }
 0x1f5   :  { %v1090_v53 = vcombine.high %v1074_v25, %v1074_v25  ;;  %v6834_v44 = vrot.slane %v4693_v23, %v5727_v58  ;;  %v1091_v63 = vcombine.high %v1081_v38, %v1081_v38  ;;  %v2625_v47 = vadd.f32 %v5770_v16, %v1067_v50 }
 0x1f6   :  { %v1092_v52 = vcombine.high %v1088_v2, %v1088_v2  ;;  %v6837_v48 = vrot.slane %v4692_v17, %v5727_v58  ;;  %v2626_v54 = vadd.f32 %v5740_v7, %v1081_v38  ;;  %v2627_v33 = vadd.f32 %v5746_v9, %v1089_v28 }
 0x1f7   :  { %v6843_v3 = vrot.slane %v4691_v36, %v5727_v58  ;;  %v2628_v0 = vadd.f32 %v5766_v15, %v1091_v63  ;;  %v2629_v37 = vadd.f32 %v5774_v18, %v1074_v25  ;;  %v2630_v34 = vadd.f32 %v5784_v22, %v1088_v2 }
 0x1f8   :  { %v6849_v24 = vrot.slane %v4745_v49, %v5727_v58  ;;  %v2631_v46 = vadd.f32 %v5749_v10, %v1090_v53  ;;  %v2632_v50 = vadd.f32 %v5755_v12, %v1092_v52  ;;  %v3683_v23 = vcombine.low %v2624_v56, %v2625_v47 }
 0x1f9   :  { %v4723_v38 = vcombine.low %v6837_v48, %v6834_v44  ;;  %v3684_v17 = vcombine.low %v2626_v54, %v2627_v33  ;;  %v3685_v36 = vcombine.low %v2628_v0, %v2629_v37  ;;  %v3737_v28 = vrot.slane %v2630_v34, %v5727_v58 }
 0x1fa   :  { %v7260_v25 = vcombine.low %v6629_v60, %v6636_v27  ;;  %v3699_v49 = vrot.slane %v3683_v23, %v5727_v58  ;;  %v3745_v63 = vcombine.low %v2631_v46, %v2632_v50  ;;  %v7261_v53 = vcombine.low %v6733_v57, %v6662_v42 }
 0x1fb   :  { %v3706_v52 = vrot.slane %v3684_v17, %v5727_v58  ;;  %v3713_v47 = vrot.slane %v3685_v36, %v5727_v58  ;;  %v3744_v54 = vrot.slane %v3737_v28, %v5727_v58  ;;  %v1926_v33 = vcombine.high %v6310_v59, %v6310_v59 }
 0x1fc   :  { %v3692_v2 = vrot.slane %v7260_v25, %v5727_v58  ;;  %v4970_v56 = vsel %vm4913_vm2, %v7261_v53, -inf  ;;  %v3755_v60 = vrot.slane %v3745_v63, %v5727_v58  ;;  %v1933_v27 = vrot.slane %v6310_v59, %v5727_v58 }
 0x1fd   :  { %v4651_v42 = vrot.slane %v4641_v1, %v5727_v58  ;;  %v3715_v57 = vcombine.low %v3706_v52, %v3713_v47  ;;  %v4973_v37 = vsel %vm4917_vm1, %v3744_v54, -inf  ;;  %v1940_v34 = vrot.slane %v1926_v33, %v5727_v58 }
 0x1fe   :  { %v3714_v0 = vcombine.low %v3692_v2, %v3699_v49  ;;  %v1191_v46 = vcombine.high %v6349_v62, %v6349_v62  ;;  %v3777_v23 = vcombine.low %v3755_v60, %v6799_v61  ;;  %v1941_v17 = vcombine.high %v1933_v27, %v1933_v27 }
 0x1ff   :  { %v1949_v59 = vrot.slane %v1933_v27, %v5727_v58  ;;  %v3729_v36 = vrot.slane %v3715_v57, %v5727_v58  ;;  %v1942_v28 = vcombine.high %v1940_v34, %v1940_v34  ;;  %v1956_v5 = vrot.slane %v1940_v34, %v5727_v58 }
 0x200   :  { %v3722_v50 = vrot.slane %v3714_v0, %v5727_v58  ;;  %v1198_v39 = vrot.slane %v6349_v62, %v5727_v58  ;;  %v6889_v1 = vrot.slane %v3777_v23, %v5727_v58  ;;  %v1963_v25 = vrot.slane %v1941_v17, %v5727_v58 }
 0x201   :  { %v1971_v2 = vcombine.high %v1949_v59, %v1949_v59  ;;  %v2769_v49 = vadd.f32 %v5781_v21, %v1949_v59  ;;  %v1970_v63 = vrot.slane %v1942_v28, %v5727_v58  ;;  %v1972_v53 = vcombine.high %v1956_v5, %v1956_v5 }
 0x202   :  { %v3730_v61 = vcombine.low %v3722_v50, %v3729_v36  ;;  %v2773_v52 = vadd.f32 %v5810_v40, %v1956_v5  ;;  %v3793_v47 = vcombine.low %v6889_v1, %v6823_v41  ;;  %v1973_v54 = vcombine.high %v1963_v25, %v1963_v25 }
 0x203   :  { %v2770_v62 = vadd.f32 %v5792_v29, %v1963_v25  ;;  %v2771_v33 = vadd.f32 %v5777_v20, %v1971_v2  ;;  %v1974_v60 = vcombine.high %v1970_v63, %v1970_v63  ;;  %v2774_v27 = vadd.f32 %v5799_v32, %v1970_v63 }
 0x204   :  { %v4971_v0 = vsel %vm4913_vm2, %v3730_v61, -inf  ;;  %v2775_v57 = vadd.f32 %v5737_v6, %v1972_v53  ;;  %v2772_v50 = vadd.f32 %v5758_v13, %v1973_v54  ;;  %v1205_v17 = vrot.slane %v1191_v46, %v5727_v58 }
 0x205   :  { %v4972_v34 = vmax.f32 %v4970_v56, %v4971_v0  ;;  %v4642_v23 = vcombine.low %v2769_v49, %v2770_v62  ;;  %v2776_v59 = vadd.f32 %v5743_v8, %v1974_v60  ;;  %v4644_v36 = vcombine.low %v2773_v52, %v2774_v27 }
 0x206   :  { %v1206_v28 = vcombine.high %v1198_v39, %v1198_v39  ;;  %v1214_v5 = vrot.slane %v1198_v39, %v5727_v58  ;;  %v4643_v2 = vcombine.low %v2771_v33, %v2772_v50  ;;  %v1207_v31 = vcombine.high %v1205_v17, %v1205_v17 }
 0x207   :  { %v4974_v25 = vmax.f32 %v4972_v34, %v4973_v37  ;;  %v4658_v61 = vrot.slane %v4642_v23, %v5727_v58  ;;  %v4672_v63 = vrot.slane %v4644_v36, %v5727_v58  ;;  %v4690_v53 = vcombine.low %v2775_v57, %v2776_v59 }
 0x208   :  { %v1221_v56 = vrot.slane %v1205_v17, %v5727_v58  ;;  %v1228_v49 = vrot.slane %v1206_v28, %v5727_v58  ;;  %v4665_v46 = vrot.slane %v4643_v2, %v5727_v58  ;;  %v6912_v52 = vrot.slane %v1207_v31, %v5727_v58 }
 0x209   :  { %v4975_v54 = vrot.slane %v4974_v25, 4  ;;  %v4673_v62 = vcombine.low %v4651_v42, %v4658_v61  ;;  %v4700_v37 = vrot.slane %v4690_v53, %v5727_v58  ;;  %v1236_v39 = vcombine.high %v1214_v5, %v1214_v5 }
 0x20a   :  { %v1237_v33 = vcombine.high %v1221_v56, %v1221_v56  ;;  %v1238_v0 = vcombine.high %v1228_v49, %v1228_v49  ;;  %v4737_v60 = vrot.slane %v4723_v38, %v5727_v58  ;;  %v5072_v27 = vsel %vm4917_vm1, %v6849_v24, -inf }
 0x20b   :  { %v4674_v57 = vcombine.low %v4665_v46, %v4672_v63  ;;  %v4681_v34 = vrot.slane %v4673_v62, %v5727_v58  ;;  %v6922_v42 = vmax.f32 %v4974_v25, %v4975_v54  ;;  %v4722_v31 = vcombine.low %v4700_v37, %v6843_v3 }
 0x20c   :  { %v2650_v50 = vadd.f32 %v5781_v21, %v1228_v49  ;;  %v2651_v23 = vadd.f32 %v5792_v29, %v1236_v39  ;;  %v2652_v59 = vadd.f32 %v5777_v20, %v1238_v0  ;;  %v2653_v44 = vadd.f32 %v5758_v13, %v1221_v56 }
 0x20d   :  { %v4688_v17 = vrot.slane %v4674_v57, %v5727_v58  ;;  %v2654_v48 = vadd.f32 %v5810_v40, %v6912_v52  ;;  %v4730_v24 = vrot.slane %v4722_v31, %v5727_v58  ;;  %v1239_v38 = vcombine.high %v6912_v52, %v6912_v52 }
 0x20e   :  { %v2655_v3 = vadd.f32 %v5799_v32, %v1237_v33  ;;  %v2073_v36 = vcombine.high %v6398_v55, %v6398_v55  ;;  %v6939_v25 = vadd.f32 %v5755_v12, %v1214_v5  ;;  %v3859_v2 = vcombine.low %v2652_v59, %v2653_v44 }
 0x20f   :  { %v4689_v28 = vcombine.low %v4681_v34, %v4688_v17  ;;  %v2080_v61 = vrot.slane %v6398_v55, %v5727_v58  ;;  %v4738_v63 = vcombine.low %v4730_v24, %v4737_v60  ;;  %v3858_v53 = vcombine.low %v2650_v50, %v2651_v23 }
 0x210   :  { %v3860_v56 = vcombine.low %v2654_v48, %v2655_v3  ;;  %v2087_v49 = vrot.slane %v2073_v36, %v5727_v58  ;;  %v3881_v46 = vrot.slane %v3859_v2, %v5727_v58  ;;  %v1142_v34 = vcombine.high %v6419_v4, %v6419_v4 }
 0x211   :  { %v5069_v54 = vsel %vm4913_vm2, %v4689_v28, -inf  ;;  %v2088_v62 = vcombine.high %v2080_v61, %v2080_v61  ;;  %v2096_v37 = vrot.slane %v2080_v61, %v5727_v58  ;;  %v5070_v39 = vsel %vm4913_vm2, %v4738_v63, -inf }
 0x212   :  { %v3888_v5 = vrot.slane %v3860_v56, %v5727_v58  ;;  %v2089_v33 = vcombine.high %v2087_v49, %v2087_v49  ;;  %v2103_v0 = vrot.slane %v2087_v49, %v5727_v58  ;;  %v5071_v55 = vmax.f32 %v5069_v54, %v5070_v39 }
 0x213   :  { %v2110_v60 = vrot.slane %v2088_v62, %v5727_v58  ;;  %v2118_v57 = vcombine.high %v2096_v37, %v2096_v37  ;;  %v6960_v3 = vrot.slane %v3858_v53, %v5727_v58  ;;  %v6965_v61 = vadd.f32 %v5743_v8, %v2096_v37 }
 0x214   :  { %v3890_v31 = vcombine.low %v3881_v46, %v3888_v5  ;;  %v2117_v50 = vrot.slane %v2089_v33, %v5727_v58  ;;  %v2119_v23 = vcombine.high %v2103_v0, %v2103_v0  ;;  %v2797_v17 = vadd.f32 %v5746_v9, %v2103_v0 }
 0x215   :  { %v6955_v59 = vmax.f32 %v5071_v55, %v5072_v27  ;;  %v2120_v44 = vcombine.high %v2110_v60, %v2110_v60  ;;  %v2794_v48 = vadd.f32 %v5762_v14, %v2110_v60  ;;  %v2795_v24 = vadd.f32 %v5770_v16, %v2118_v57 }
 0x216   :  { %v2121_v36 = vcombine.high %v2117_v50, %v2117_v50  ;;  %v2798_v28 = vadd.f32 %v5766_v15, %v2117_v50  ;;  %v2799_v2 = vadd.f32 %v5774_v18, %v2119_v23  ;;  %v1149_v56 = vrot.slane %v6419_v4, %v5727_v58 }
 0x217   :  { %v2796_v63 = vadd.f32 %v5740_v7, %v2120_v44  ;;  %v4803_v27 = vcombine.low %v2794_v48, %v2795_v24  ;;  %v6971_v49 = vrot.slane %v3890_v31, %v5727_v58  ;;  %v1156_v46 = vrot.slane %v1142_v34, %v5727_v58 }
 0x218   :  { %v2800_v53 = vadd.f32 %v5784_v22, %v2121_v36  ;;  %v4805_v54 = vcombine.low %v2798_v28, %v2799_v2  ;;  %v1157_v39 = vcombine.high %v1149_v56, %v1149_v56  ;;  %v1165_v5 = vrot.slane %v1149_v56, %v5727_v58 }
 0x219   :  { %v4804_v62 = vcombine.low %v2796_v63, %v2797_v17  ;;  %v3804_v37 = vrot.slane %v3794_v45, %v5727_v58  ;;  %v1158_v0 = vcombine.high %v1156_v46, %v1156_v46  ;;  %v1172_v55 = vrot.slane %v1156_v46, %v5727_v58 }
 0x21a   :  { %v4833_v33 = vrot.slane %v4805_v54, %v5727_v58  ;;  %v4857_v4 = vrot.slane %v2800_v53, %v5727_v58  ;;  %v6984_v60 = vrot.slane %v4803_v27, %v5727_v58  ;;  %v1179_v34 = vrot.slane %v1157_v39, %v5727_v58  ;;  %v7262_v39 = vld [vmem:[#allocation8_spill] sm:$0xff] }
 0x21b   :  { %v4826_v57 = vrot.slane %v4804_v62, %v5727_v58  ;;  %v1187_v31 = vcombine.high %v1165_v5, %v1165_v5  ;;  %v1186_v11 = vrot.slane %v1158_v0, %v5727_v58  ;;  %v1188_v19 = vcombine.high %v1172_v55, %v1172_v55 }
 0x21c   :  { %v4864_v50 = vrot.slane %v4857_v4, %v5727_v58  ;;  %v2641_v45 = vadd.f32 %v5762_v14, %v1165_v5  ;;  %v1189_v17 = vcombine.high %v1179_v34, %v1179_v34  ;;  %v2642_v44 = vadd.f32 %v5770_v16, %v1179_v34 }
 0x21d   :  { %v4835_v23 = vcombine.low %v4826_v57, %v4833_v33  ;;  %v2645_v48 = vadd.f32 %v5766_v15, %v1172_v55  ;;  %v1190_v24 = vcombine.high %v1186_v11, %v1186_v11  ;;  %v2643_v36 = vadd.f32 %v5740_v7, %v1187_v31 }
 0x21e   :  { %v2646_v28 = vadd.f32 %v5774_v18, %v1186_v11  ;;  %v2647_v2 = vadd.f32 %v5784_v22, %v1188_v19  ;;  %v7000_v27 = vsel %vm4917_vm1, %v4864_v50, -inf  ;;  %v2644_v56 = vadd.f32 %v5746_v9, %v1189_v17 }
 0x21f   :  { %v6997_v63 = vrot.slane %v4835_v23, %v5727_v58  ;;  %v3795_v53 = vcombine.low %v2641_v45, %v2642_v44  ;;  %v2648_v54 = vadd.f32 %v5749_v10, %v1190_v24  ;;  %v2024_v5 = vcombine.high %v7262_v39, %v7262_v39 }
 0x220   :  { %v3797_v46 = vcombine.low %v2645_v48, %v2646_v28  ;;  %v3849_v62 = vrot.slane %v2647_v2, %v5727_v58  ;;  %v3796_v33 = vcombine.low %v2643_v36, %v2644_v56  ;;  %v4981_v0 = vsel %vm4913_vm2, %v3793_v47, -inf }
 0x221   :  { %v3811_v4 = vrot.slane %v3795_v53, %v5727_v58  ;;  %v2031_v55 = vrot.slane %v7262_v39, %v5727_v58  ;;  %v3857_v34 = vcombine.low %v2648_v54, %v6939_v25  ;;  %v2038_v31 = vrot.slane %v2024_v5, %v5727_v58 }
 0x222   :  { %v3825_v57 = vrot.slane %v3797_v46, %v5727_v58  ;;  %v7263_v50 = vcombine.high %v6808_v35, %v6808_v35  ;;  %v3818_v19 = vrot.slane %v3796_v33, %v5727_v58  ;;  %v3856_v47 = vrot.slane %v3849_v62, %v5727_v58 }
 0x223   :  { %v3826_v45 = vcombine.low %v3804_v37, %v3811_v4  ;;  %v2039_v41 = vcombine.high %v2031_v55, %v2031_v55  ;;  %v2047_v1 = vrot.slane %v2031_v55, %v5727_v58  ;;  %v3867_v23 = vrot.slane %v3857_v34, %v5727_v58 }
 0x224   :  { %v2784_v11 = vadd.f32 %v5749_v10, %v7263_v50  ;;  %v2040_v17 = vcombine.high %v2038_v31, %v2038_v31  ;;  %v2054_v25 = vrot.slane %v2038_v31, %v5727_v58  ;;  %v3827_v44 = vcombine.low %v3818_v19, %v3825_v57  ;;  %v7264_v50 = vld [vmem:[#allocation9_spill] sm:$0xff] }
 0x225   :  { %v3834_v48 = vrot.slane %v3826_v45, %v5727_v58  ;;  %v2061_v35 = vrot.slane %v2039_v41, %v5727_v58  ;;  %v2069_v24 = vcombine.high %v2047_v1, %v2047_v1  ;;  %v3889_v36 = vcombine.low %v3867_v23, %v6960_v3 }
 0x226   :  { %v2068_v37 = vrot.slane %v2040_v17, %v5727_v58  ;;  %v2070_v28 = vcombine.high %v2054_v25, %v2054_v25  ;;  %v2785_v2 = vadd.f32 %v5755_v12, %v2047_v1  ;;  %v3841_v56 = vrot.slane %v3827_v44, %v5727_v58 }
 0x227   :  { %v2071_v53 = vcombine.high %v2061_v35, %v2061_v35  ;;  %v2786_v54 = vadd.f32 %v5781_v21, %v2061_v35  ;;  %v2787_v46 = vadd.f32 %v5792_v29, %v2069_v24  ;;  %v4984_v62 = vsel %vm4917_vm1, %v3856_v47, -inf }
 0x228   :  { %v2072_v39 = vcombine.high %v2068_v37, %v2068_v37  ;;  %v2789_v5 = vadd.f32 %v5758_v13, %v2054_v25  ;;  %v2790_v33 = vadd.f32 %v5810_v40, %v2068_v37  ;;  %v3842_v3 = vcombine.low %v3834_v48, %v3841_v56 }
 0x229   :  { %v2788_v4 = vadd.f32 %v5777_v20, %v2071_v53  ;;  %v2791_v55 = vadd.f32 %v5799_v32, %v2070_v28  ;;  %v4753_v57 = vcombine.low %v2784_v11, %v2785_v2  ;;  %v4754_v31 = vcombine.low %v2786_v54, %v2787_v46 }
 0x22a   :  { %v2792_v34 = vadd.f32 %v5737_v6, %v2072_v39  ;;  %v1289_v19 = vcombine.high %v7264_v50, %v7264_v50  ;;  %v1296_v45 = vrot.slane %v7264_v50, %v5727_v58  ;;  %v4982_v41 = vsel %vm4913_vm2, %v3842_v3, -inf }
 0x22b   :  { %v4755_v1 = vcombine.low %v2788_v4, %v2789_v5  ;;  %v4756_v47 = vcombine.low %v2790_v33, %v2791_v55  ;;  %v4763_v23 = vrot.slane %v4753_v57, %v5727_v58  ;;  %v4983_v17 = vmax.f32 %v4981_v0, %v4982_v41 }
 0x22c   :  { %v4770_v25 = vrot.slane %v4754_v31, %v5727_v58  ;;  %v4802_v11 = vcombine.low %v2792_v34, %v6965_v61  ;;  %v1303_v44 = vrot.slane %v1289_v19, %v5727_v58  ;;  %v1304_v24 = vcombine.high %v1296_v45, %v1296_v45 }
 0x22d   :  { %v4777_v48 = vrot.slane %v4755_v1, %v5727_v58  ;;  %v4784_v35 = vrot.slane %v4756_v47, %v5727_v58  ;;  %v1312_v37 = vrot.slane %v1296_v45, %v5727_v58  ;;  %v7052_v28 = vmax.f32 %v4983_v17, %v4984_v62 }
 0x22e   :  { %v4785_v2 = vcombine.low %v4763_v23, %v4770_v25  ;;  %v4812_v56 = vrot.slane %v4802_v11, %v5727_v58  ;;  %v1305_v53 = vcombine.high %v1303_v44, %v1303_v44  ;;  %v1319_v54 = vrot.slane %v1303_v44, %v5727_v58  ;;  %v7265_v11 = vld [vmem:[#allocation20_spill] sm:$0xff] }
 0x22f   :  { %v4786_v0 = vcombine.low %v4777_v48, %v4784_v35  ;;  %v1326_v61 = vrot.slane %v1304_v24, %v5727_v58  ;;  %v1334_v46 = vcombine.high %v1312_v37, %v1312_v37  ;;  %v7058_v39 = vrot.slane %v3889_v36, %v5727_v58 }
 0x230   :  { %v4793_v5 = vrot.slane %v4785_v2, %v5727_v58  ;;  %v4834_v33 = vcombine.low %v4812_v56, %v6984_v60  ;;  %v1333_v62 = vrot.slane %v1305_v53, %v5727_v58  ;;  %v1335_v4 = vcombine.high %v1319_v54, %v1319_v54 }
 0x231   :  { %v4800_v3 = vrot.slane %v4786_v0, %v5727_v58  ;;  %v1336_v55 = vcombine.high %v1326_v61, %v1326_v61  ;;  %v2665_v57 = vadd.f32 %v5749_v10, %v1312_v37  ;;  %v2666_v50 = vadd.f32 %v5755_v12, %v1326_v61 }
 0x232   :  { %v4842_v34 = vrot.slane %v4834_v33, %v5727_v58  ;;  %v1337_v31 = vcombine.high %v1333_v62, %v1333_v62  ;;  %v2667_v36 = vadd.f32 %v5781_v21, %v1334_v46  ;;  %v2669_v60 = vadd.f32 %v5777_v20, %v1319_v54 }
 0x233   :  { %v4801_v19 = vcombine.low %v4793_v5, %v4800_v3  ;;  %v2668_v45 = vadd.f32 %v5792_v29, %v1336_v55  ;;  %v2670_v41 = vadd.f32 %v5758_v13, %v1333_v62  ;;  %v2671_v47 = vadd.f32 %v5810_v40, %v1335_v4 }
 0x234   :  { %v4850_v1 = vcombine.low %v4842_v34, %v6997_v63  ;;  %v2672_v10 = vadd.f32 %v5799_v32, %v1337_v31  ;;  %v3969_v23 = vcombine.low %v2665_v57, %v2666_v50  ;;  %v1240_v21 = vcombine.high %v7265_v11, %v7265_v11  ;;  %v5130_v57 = vld [vmem:[%s7200_s3] sm:$0xff] }
 0x235   :  { %v5080_v17 = vsel %vm4913_vm2, %v4801_v19, -inf  ;;  %v3970_v25 = vcombine.low %v2667_v36, %v2668_v45  ;;  %v3971_v12 = vcombine.low %v2669_v60, %v2670_v41  ;;  %v1247_v13 = vrot.slane %v7265_v11, %v5727_v58 }
 0x236   :  { %v5081_v29 = vsel %vm4913_vm2, %v4850_v1, -inf  ;;  %v3972_v44 = vcombine.low %v2671_v47, %v2672_v10  ;;  %v3979_v20 = vrot.slane %v3969_v23, %v5727_v58  ;;  %v1254_v48 = vrot.slane %v1240_v21, %v5727_v58  ;;  %v7266_v10 = vld [vmem:[#allocation14_spill] sm:$0xff] }
 0x237   :  { %v5082_v63 = vmax.f32 %v5080_v17, %v5081_v29  ;;  %v3986_v40 = vrot.slane %v3970_v25, %v5727_v58  ;;  %v3993_v32 = vrot.slane %v3971_v12, %v5727_v58  ;;  %v1255_v24 = vcombine.high %v1247_v13, %v1247_v13 }
 0x238   :  { %v4000_v35 = vrot.slane %v3972_v44, %v5727_v58  ;;  %v1263_v37 = vrot.slane %v1247_v13, %v5727_v58  ;;  %v2656_v2 = vadd.f32 %v5737_v6, %v1239_v38  ;;  %v1256_v0 = vcombine.high %v1254_v48, %v1254_v48 }
 0x239   :  { %v7091_v56 = vmax.f32 %v5082_v63, %v7000_v27  ;;  %v4001_v53 = vcombine.low %v3979_v20, %v3986_v40  ;;  %v1270_v54 = vrot.slane %v1254_v48, %v5727_v58  ;;  %v1277_v46 = vrot.slane %v1255_v24, %v5727_v58  ;;  %v7268_v20 = vld [vmem:[#allocation10_spill] sm:$0xff] }
 0x23a   :  { %v4002_v61 = vcombine.low %v3993_v32, %v4000_v35  ;;  %v1285_v5 = vcombine.high %v1263_v37, %v1263_v37  ;;  %v2657_v33 = vadd.f32 %v5743_v8, %v1263_v37  ;;  %v1284_v3 = vrot.slane %v1256_v0, %v5727_v58  ;;  %v5131_v8 = vld [vmem:[%s7200_s3 + $0x8] sm:$0xff] }
 0x23b   :  { %v4009_v62 = vrot.slane %v4001_v53, %v5727_v58  ;;  %v1286_v52 = vcombine.high %v1270_v54, %v1270_v54  ;;  %v2661_v6 = vadd.f32 %v5746_v9, %v1270_v54  ;;  %v1287_v27 = vcombine.high %v1277_v46, %v1277_v46 }
 0x23c   :  { %v4016_v38 = vrot.slane %v4002_v61, %v5727_v58  ;;  %v2658_v4 = vadd.f32 %v5762_v14, %v1277_v46  ;;  %v2659_v55 = vadd.f32 %v5770_v16, %v1285_v5  ;;  %v1288_v34 = vcombine.high %v1284_v3, %v1284_v3  ;;  %v7269_v5 = vld [vmem:[#allocation12_spill] sm:$0xff] }
 0x23d   :  { %v2662_v31 = vadd.f32 %v5766_v15, %v1284_v3  ;;  %v2663_v9 = vadd.f32 %v5774_v18, %v1286_v52  ;;  %v3905_v50 = vcombine.low %v7058_v39, %v6971_v49  ;;  %v2660_v14 = vadd.f32 %v5740_v7, %v1287_v27  ;;  %v5132_v15 = vld [vmem:[%s7200_s3 + $0x10] sm:$0xff]  ;;  %v5133_v18 = vld [vmem:[%s7200_s3 + $0x18] sm:$0x3f] }
 0x23e   :  { %v4017_v36 = vcombine.low %v4009_v62, %v4016_v38  ;;  %v3906_v16 = vcombine.low %v2656_v2, %v2657_v33  ;;  %v3907_v19 = vcombine.low %v2658_v4, %v2659_v55  ;;  %v4986_v45 = vrot.slane %v7052_v28, 4 }
 0x23f   :  { %v2664_v60 = vadd.f32 %v5784_v22, %v1288_v34  ;;  %v3909_v41 = vcombine.low %v2662_v31, %v2663_v9  ;;  %v5511_v1 = vpack.c.bf16 %v5131_v8, %v5130_v57  ;;  %v3908_v39 = vcombine.low %v2660_v14, %v2661_v6 }
 0x240   :  { %v5003_v49 = vsel %vm4913_vm2, %v4017_v36, -inf  ;;  %v3916_v7 = vrot.slane %v3906_v16, %v5727_v58  ;;  %v3923_v47 = vrot.slane %v3907_v19, %v5727_v58  ;;  %v5515_v11 = vpack.c.bf16 %v5133_v18, %v5132_v15 }
 0x241   :  { %v5005_v23 = vmax.f32 %v5003_v49, %v7266_v10  ;;  %v3937_v22 = vrot.slane %v3909_v41, %v5727_v58  ;;  %v3961_v17 = vrot.slane %v2664_v60, %v5727_v58  ;;  %5512 = vmatprep.subr.bf16.mxu1 %v5511_v1  ;;  %v3930_v25 = vrot.slane %v3908_v39, %v5727_v58  ;;  %v5549_v39 = vld [vmem:[%s7199_s2] ss:$0 sm:$0xff] }
 0x242   :  { %v3938_v12 = vcombine.low %v3916_v7, %v3923_v47  ;;  %5514 = vmatpush3.bf16.msra.mxu1 %v5511_v1  ;;  %v7267_v21 = vrot.slane %v6796_v26, 4  ;;  %v5074_v44 = vrot.slane %v6955_v59, 4  ;;  %v4992_v32 = vsel %vm4913_vm2, %v3905_v50, -inf  ;;  %v7273_v7 = vld [vmem:[#allocation18_spill] sm:$0xff] }
 0x243   :  { %v5007_v13 = vmax.f32 %v5005_v23, %v7268_v20  ;;  %v3968_v63 = vrot.slane %v3961_v17, %v5727_v58  ;;  %v3939_v40 = vcombine.low %v3930_v25, %v3937_v22  ;;  %5517 = vmatprep.subr.msk.bf16.mxu1 %vm5516_vm5, %v5515_v11  ;;  %v4977_v48 = vrot.slane %v6922_v42, 2  ;;  %v7274_v22 = vld [vmem:[#allocation11_spill] sm:$0xff] }
 0x244   :  { %v5064_v29 = vmax.f32 %v6796_v26, %v7267_v21  ;;  %v4987_v35 = vmax.f32 %v7052_v28, %v4986_v45  ;;  %v3946_v37 = vrot.slane %v3938_v12, %v5727_v58  ;;  %v4957_v26 = vrot.slane %v6633_v30, 1 }
 0x245   :  { %v5008_v24 = vrot.slane %v5007_v13, 4  ;;  %v4968_v2 = vrot.slane %v6789_v43, 1  ;;  %v3953_v53 = vrot.slane %v3939_v40, %v5727_v58  ;;  %v4995_v0 = vsel %vm4917_vm1, %v3968_v63, -inf  ;;  %v7275_v63 = vld [vmem:[#allocation17_spill] sm:$0xff] }
 0x246   :  { %5520 = vmatpush3.bf16.msk.msra.mxu1 %vm5516_vm5, %v5515_v11  ;;  %v4978_v54 = vmax.f32 %v6922_v42, %v4977_v48  ;;  %v4988_v61 = vrot.slane %v4987_v35, 2  ;;  %v5045_v33 = vrot.slane %v7269_v5, 1  ;;  %v7270_v28 = vrot.slane %v6659_v51, 2 }
 0x247   :  { %v5009_v46 = vmax.f32 %v5007_v13, %v5008_v24  ;;  %v5065_v3 = vrot.slane %v5064_v29, 2  ;;  %v3954_v52 = vcombine.low %v3946_v37, %v3953_v53  ;;  %v5075_v27 = vmax.f32 %v6955_v59, %v5074_v44 }
 0x248   :  { %v5055_v62 = vmax.f32 %v6659_v51, %v7270_v28  ;;  %v4979_v6 = vrot.slane %v4978_v54, 1  ;;  %v4989_v38 = vmax.f32 %v4987_v35, %v4988_v61  ;;  %v4958_v4 = vmax.f32 %v6633_v30, %v4957_v26  ;;  %v7271_v51 = vld [vmem:[#allocation19_spill] sm:$0xff] }
 0x249   :  { %v5010_v58 = vrot.slane %v5009_v46, 2  ;;  %v5066_v57 = vmax.f32 %v5064_v29, %v5065_v3  ;;  %v4993_v42 = vsel %vm4913_vm2, %v3954_v52, -inf  ;;  %v4969_v8 = vmax.f32 %v6789_v43, %v4968_v2 }
 0x24a   :  { %v5056_v55 = vrot.slane %v5055_v62, 1  ;;  %v4990_v34 = vrot.slane %v4989_v38, 1  ;;  %v5076_v31 = vrot.slane %v5075_v27, 2  ;;  %v4994_v50 = vmax.f32 %v4992_v32, %v4993_v42  ;;  %v7276_v42 = vld [vmem:[#allocation16_spill] sm:$0xff] }
 0x24b   :  { %v5011_v9 = vmax.f32 %v5009_v46, %v5010_v58  ;;  %v7272_v36 = vrot.slane %v7271_v51, 1  ;;  %v5067_v16 = vrot.slane %v5066_v57, 1  ;;  %v4980_v19 = vmax.f32 %v4978_v54, %v4979_v6 }
 0x24c   :  { %v5046_v59 = vmax.f32 %v7269_v5, %v5045_v33  ;;  %v5077_v45 = vmax.f32 %v5075_v27, %v5076_v31  ;;  %v5085_v30 = vrot.slane %v7091_v56, 4  ;;  %v4991_v41 = vmax.f32 %v4989_v38, %v4990_v34 }
 0x24d   :  { %v5035_v14 = vmax.f32 %v7271_v51, %v7272_v36  ;;  %v5012_v60 = vrot.slane %v5011_v9, 1  ;;  %v4996_v1 = vmax.f32 %v4994_v50, %v4995_v0  ;;  %v5057_v15 = vmax.f32 %v5055_v62, %v5056_v55 }
 0x24e   :  { %v5068_v43 = vmax.f32 %v5066_v57, %v5067_v16  ;;  %v5078_v18 = vrot.slane %v5077_v45, 1  ;;  %v5086_v49 = vmax.f32 %v7091_v56, %v5085_v30  ;;  %v5099_v47 = vadd.f32 %v5549_v39, %v7273_v7 }
 0x24f   :  { %v5013_v10 = vmax.f32 %v5011_v9, %v5012_v60  ;;  %v4997_v23 = vrot.slane %v4996_v1, 4  ;;  %v5100_v17 = vadd.f32 %v5549_v39, %v7274_v22  ;;  %v5101_v25 = vadd.f32 %v5549_v39, %v4958_v4 }
 0x250   :  { %v5079_v12 = vmax.f32 %v5077_v45, %v5078_v18  ;;  %v5087_v11 = vrot.slane %v5086_v49, 2  ;;  %v5102_v21 = vadd.f32 %v5549_v39, %v4969_v8  ;;  %v5103_v29 = vadd.f32 %v5549_v39, %v4980_v19 }
 0x251   :  { %v4998_v44 = vmax.f32 %v4996_v1, %v4997_v23  ;;  %v5104_v20 = vadd.f32 %v5549_v39, %v4991_v41  ;;  %v5106_v13 = vadd.f32 %v5549_v39, %v5013_v10  ;;  %v5107_v56 = vadd.f32 %v5549_v39, %v7275_v63 }
 0x252   :  { %v5088_v40 = vmax.f32 %v5086_v49, %v5087_v11  ;;  %v5108_v32 = vadd.f32 %v5549_v39, %v5035_v14  ;;  %v5109_v48 = vadd.f32 %v5549_v39, %v5046_v59  ;;  %v5110_v35 = vadd.f32 %v5549_v39, %v5057_v15 }
 0x253   :  { %v4999_v24 = vrot.slane %v4998_v44, 2  ;;  %v5111_v37 = vadd.f32 %v5549_v39, %v5068_v43  ;;  %v5115_v26 = vmax.f32 %v5099_v47, 0.0  ;;  %v5116_v2 = vmax.f32 %v5100_v17, 0.0 }
 0x254   :  { %v5089_v53 = vrot.slane %v5088_v40, 1  ;;  %v5112_v0 = vadd.f32 %v5549_v39, %v5079_v12  ;;  %v5117_v54 = vmax.f32 %v5101_v25, 0.0  ;;  %v5118_v61 = vmax.f32 %v5102_v21, 0.0 }
 0x255   :  { %v5000_v46 = vmax.f32 %v4998_v44, %v4999_v24  ;;  %v5119_v5 = vmax.f32 %v5103_v29, 0.0  ;;  %v5120_v33 = vmax.f32 %v5104_v20, 0.0  ;;  %v5122_v28 = vmax.f32 %v5106_v13, 0.0  ;;  %v5343_v44 = vld [vmem:[%s7201_s4] ss:$0 sm:$0xff]  ;;  %s5572_s4 = scalar_lea.vmem %s5296_s28, 256 }
 0x256   :  { %v5090_v62 = vmax.f32 %v5088_v40, %v5089_v53  ;;  %v5123_v3 = vmax.f32 %v5107_v56, 0.0  ;;  %v5124_v52 = vmax.f32 %v5108_v32, 0.0  ;;  %v5125_v6 = vmax.f32 %v5109_v48, 0.0  ;;  %p5573_p8 = scmp.ne.s32.totalorder %s5296_s28, %s5572_s4  ;;  %p5578_p10 = scmp.lt.s32.totalorder %s5572_s4, %s5572_s4 }
 0x257   :  { %v5001_v38 = vrot.slane %v5000_v46, 1  ;;  %v5157_v27 = vrot.slane %v5115_v26, 7  ;;  %v5160_v58 = vrot.slane %v5116_v2, 6  ;;  %v5163_v55 = vrot.slane %v5117_v54, 5 }
 0x258   :  { %v5113_v4 = vadd.f32 %v5549_v39, %v5090_v62  ;;  %v7277_v8 = vmax.f32 %v7276_v42, 0.0  ;;  %v5166_v31 = vrot.slane %v5118_v61, 4  ;;  %v5126_v9 = vmax.f32 %v5110_v35, 0.0  ;;  %p5579_p11 = por %p5578_p10, %p5577_p9 }
 0x259   :  { %v5002_v57 = vmax.f32 %v5000_v46, %v5001_v38  ;;  %v5169_v51 = vrot.slane %v5119_v5, 3  ;;  %v5172_v16 = vrot.slane %v5120_v33, 2  ;;  %v5127_v19 = vmax.f32 %v5111_v37, 0.0 }
 0x25a   :  { %v5159_v34 = vsel %vm5158_vm6, %v5157_v27, %v7277_v8  ;;  %v5128_v59 = vmax.f32 %v5112_v0, 0.0  ;;  %v5178_v30 = vrot.slane %v5123_v3, 7  ;;  %v5129_v41 = vmax.f32 %v5113_v4, 0.0  ;;  %p5580_p12 = pnand %p5579_p11, %p5573_p8 }
 0x25b   :  { %v5162_v50 = vsel %vm5161_vm7, %v5160_v58, %v5159_v34  ;;  %v5105_v36 = vadd.f32 %v5549_v39, %v5002_v57  ;;  %v5180_v15 = vrot.slane %v5124_v52, 6  ;;  %v5182_v49 = vrot.slane %v5125_v6, 5 }
 0x25c   :  { %v5165_v14 = vsel %vm5164_vm8, %v5163_v55, %v5162_v50  ;;  %v5179_v18 = vsel %vm5158_vm6, %v5178_v30, %v5122_v28  ;;  %v5184_v47 = vrot.slane %v5126_v9, 4  ;;  %v5186_v23 = vrot.slane %v5127_v19, 3 }
 0x25d   :  { %v5168_v45 = vsel %vm5167_vm9, %v5166_v31, %v5165_v14  ;;  %v5121_v60 = vmax.f32 %v5105_v36, 0.0  ;;  %v5181_v7 = vsel %vm5161_vm7, %v5180_v15, %v5179_v18  ;;  %v5188_v25 = vrot.slane %v5128_v59, 2 }
 0x25e   :  { %v5171_v1 = vsel %vm5170_vm10, %v5169_v51, %v5168_v45  ;;  %v5183_v10 = vsel %vm5164_vm8, %v5182_v49, %v5181_v7  ;;  %v5190_v11 = vrot.slane %v5129_v41, 1 }
 0x25f   :  { %v5174_v43 = vsel %vm5173_vm11, %v5172_v16, %v5171_v1  ;;  %v5175_v39 = vrot.slane %v5121_v60, 1  ;;  %v5185_v17 = vsel %vm5167_vm9, %v5184_v47, %v5183_v10 }
 0x260   :  { %v5187_v12 = vsel %vm5170_vm10, %v5186_v23, %v5185_v17 }
 0x261   :  { %v5177_v22 = vsel %vm5176_vm12, %v5175_v39, %v5174_v43  ;;  %v5189_v21 = vsel %vm5173_vm11, %v5188_v25, %v5187_v12 }
 0x262   :  { %5484 = vmatprep.mubr.msk.f32.mxu1 %vm4913_vm2, %v5177_v22  ;;  %v5191_v29 = vsel %vm5176_vm12, %v5190_v11, %v5189_v21 }
 0x263   :  { %5485 = vmatmul.mubr.msk.f32.vlgmr.msra.gmra.mrb[16].mxu1 %vm4913_vm2, %v5191_v29 }
 0x336   :  { %v5486_v20 = vpop.f32.mrb[16].mxu1 }
 0x337   :  { %v5272_v13 = vadd.f32 %v5486_v20, %v5343_v44  ;;  %v5266_v63 = vpop.f32.mrb[17].mxu1 }
 0x338   :  { %v5267_v56 = vadd.f32 %v5343_v44, %v5266_v63 }
 0x339   :  { %v5348_v40 = vmul.f32 -1.442695, %v5272_v13 }
 0x33a   :  { %v5347_v32 = vmul.f32 -1.442695, %v5267_v56 }
 0x33b   :  { %5541 = vpow2.f32 %v5348_v40 }
 0x33c   :  { %5543 = vpow2.f32 %v5347_v32 }
 0x345   :  { %v5542_v48 = vpop.eup %5541 }
 0x346   :  { %v5544_v35 = vpop.eup %5543  ;;  %v5282_v24 = vadd.f32 1.0, %v5542_v48 }
 0x347   :  { %v5281_v37 = vadd.f32 1.0, %v5544_v35 }
 0x348   :  { %5545 = vrcp.f32 %v5282_v24 }
 0x349   :  { %5547 = vrcp.f32 %v5281_v37 }
 0x352   :  { %v5546_v26 = vpop.eup %5545 }
 0x353   :  { %v5548_v2 = vpop.eup %5547  ;;  %5289 = vst.msk [vmem:[#allocation5 + $0x8] sm:$0xff] %vm5287_vm13, %v5546_v26 }
 0x354   :  { %5288 = vst.msk [vmem:[#allocation5] sm:$0xff] %vm5287_vm13, %v5548_v2 }
 0x355   :  { %5583 = shalt.err (!%p5580_p12)
}
 0x356   :  { %s5584_s9 = scalar_lea.hbm %s7203_s6, 256 }
 0x357   :  { %p5585_p13 = scmp.ne.s32.totalorder %s7203_s6, %s5584_s9  ;;  %p5588_p0 = scmp.lt.u32.totalorder %s5584_s9, %s7203_s6 }
 0x359   :  { %p5590_p1 = pnand %p5588_p0, %p5585_p13 }
 0x35b   :  { %5593 = shalt.err (!%p5590_p1)
}
 0x35c   :  { %5301 = dma.vmem_to_hbm [thread:$0]  %s5296_s28, 256, %s7203_s6, [#allocation4], %s5599_s7, %s5599_s7, %s5600_s8  }
 0x35d   :  { %5596 = dma.done.wait [#allocation4], 256  }
 0x35e   :  { %5597 = vsyncadd [#allocation4], 4294967040 }
 0x35f   :  { %5305 = vsyncpa [#allocation3], 1 }
 0x360   :  { %5306 = vsyncpa [#allocation4], 1 }

</bundles_post_ra>
